<compile_context>
chip_gen: v5e
topology: v5e:2x2
jax: 0.10.0
libtpu: 0.0.40
codegen_flags: <defaults>
</compile_context>

<pallas_src>
import functools
import math

import jax
import jax.numpy as jnp
import numpy as np
from jax.experimental import pallas as pl
from jax.experimental.pallas import tpu as pltpu

EPS = 1e-6
NEG_INF = -1e30


def _layernorm(h):
    # LayerNorm(elementwise_affine=False, eps=1e-6), biased variance (PyTorch semantics)
    mean = jnp.mean(h, axis=-1, keepdims=True)
    var = jnp.mean(jnp.square(h - mean), axis=-1, keepdims=True)
    return (h - mean) * jax.lax.rsqrt(var + EPS)


def _gelu(x):
    # exact (erf-based) gelu, as used by ESM's `gelu`
    return 0.5 * x * (1.0 + jax.lax.erf(x / math.sqrt(2.0)))


def _vamd_layer_kernel(x_q_ref, x_kv_ref, mask_ref, ada_ref,
                       wq_ref, bq_ref, wk_ref, bk_ref, wv_ref, bv_ref,
                       bias_k_ref, bias_v_ref, wo_ref, bo_ref,
                       w1_ref, b1_ref, w2_ref, b2_ref,
                       o_ref,
                       q_sc, k_sc, v_sc, m_sc, l_sc, acc_sc,
                       *, num_heads, head_dim):
    H, dh = num_heads, head_dim
    D = H * dh
    TQ = x_q_ref.shape[1]
    ki = pl.program_id(2)

    ada = ada_ref[0]                      # (6, D) f32, rows = adaLN chunks (cheap sublane slices)
    shift_mha = ada[0:1, :]
    scale_mha = ada[1:2, :]
    gate_mha = ada[2:3, :]
    shift_mlp = ada[3:4, :]
    scale_mlp = ada[4:5, :]
    gate_mlp = ada[5:6, :]

    # ---- ki == 0: project queries for this q-tile, init online-softmax state with the
    #      add_bias_kv "bias token" (which is never masked) ----
    @pl.when(ki == 0)
    def _init():
        xq = x_q_ref[0]                                               # (TQ, D) f32
        hq = (_layernorm(xq) * (1.0 + scale_mha) + shift_mha).astype(jnp.bfloat16)
        q = jnp.dot(hq, wq_ref[...], preferred_element_type=jnp.float32) + bq_ref[...]
        q = q * (1.0 / math.sqrt(dh))
        for h in range(H):                                            # head-major staging
            q_sc[h] = q[:, h * dh:(h + 1) * dh].astype(jnp.bfloat16)
        # bias-key score on the VPU (multiply + lane reduce), not an N=1 MXU matmul
        score_b = jnp.sum(q_sc[...].astype(jnp.float32) * bias_k_ref[...],
                          axis=-1, keepdims=True)                     # (H, TQ, 1)
        m_sc[...] = score_b                                           # running max
        l_sc[...] = jnp.ones_like(l_sc)                               # exp(score_b - m) == 1
        acc_sc[...] = jnp.broadcast_to(bias_v_ref[...], acc_sc.shape)  # 1 * bias_v

    # ---- every ki: one K/V tile -> LN + modulate + K/V projection + online softmax ----
    xkv = x_kv_ref[0]                                                 # (TK, D) f32
    hk = (_layernorm(xkv) * (1.0 + scale_mha) + shift_mha).astype(jnp.bfloat16)
    k = jnp.dot(hk, wk_ref[...], preferred_element_type=jnp.float32) + bk_ref[...]
    v = jnp.dot(hk, wv_ref[...], preferred_element_type=jnp.float32) + bv_ref[...]
    for h in range(H):                                                # stage head-major (no reshape)
        k_sc[h] = k[:, h * dh:(h + 1) * dh].astype(jnp.bfloat16)
        v_sc[h] = v[:, h * dh:(h + 1) * dh].astype(jnp.bfloat16)

    # additive key-padding bias, computed once per KV tile (not per head)
    mask_bias = jnp.where(mask_ref[0] > 0.5, 0.0, NEG_INF)            # (1, TK)

    # batched-over-heads attention with online softmax (f32 softmax math, bf16 matmuls)
    s = jnp.einsum('hqd,hkd->hqk', q_sc[...], k_sc[...],
                   preferred_element_type=jnp.float32)                # (H, TQ, TK)
    s = s + mask_bias[None, :, :]

    m_prev = m_sc[...]
    m_new = jnp.maximum(m_prev, jnp.max(s, axis=-1, keepdims=True))
    alpha = jnp.exp(m_prev - m_new)
    p = jnp.exp(s - m_new)
    l_sc[...] = alpha * l_sc[...] + jnp.sum(p, axis=-1, keepdims=True)
    acc_sc[...] = alpha * acc_sc[...] + jnp.einsum(
        'hqk,hkd->hqd', p.astype(jnp.bfloat16), v_sc[...],
        preferred_element_type=jnp.float32)
    m_sc[...] = m_new

    # ---- last ki: finish attention, output projection, residual + FFN ----
    @pl.when(ki == pl.num_programs(2) - 1)
    def _finalize():
        inv_l = pl.reciprocal(l_sc[...], approx=True)                 # (H, TQ, 1)
        # output projection with pre-split wo: no masked-store re-assembly of ctx
        attn = jnp.zeros((TQ, D), jnp.float32)
        for h in range(H):
            ctx_h = (acc_sc[h] * inv_l[h]).astype(jnp.bfloat16)       # (TQ, dh)
            attn = attn + jnp.dot(ctx_h, wo_ref[h],
                                  preferred_element_type=jnp.float32)
        attn = attn + bo_ref[...]

        xq = x_q_ref[0]
        x1 = xq + gate_mha * attn                                     # residual 1 (f32)

        h2 = (_layernorm(x1) * (1.0 + scale_mlp) + shift_mlp).astype(jnp.bfloat16)
        h2 = jnp.dot(h2, w1_ref[...], preferred_element_type=jnp.float32) + b1_ref[...]
        h2 = _gelu(h2).astype(jnp.bfloat16)
        h2 = jnp.dot(h2, w2_ref[...], preferred_element_type=jnp.float32) + b2_ref[...]
        o_ref[0, :, :] = (x1 + gate_mlp * h2).astype(o_ref.dtype)     # residual 2 (f32)


def vamd_layer(x, t, mask, params, *, num_heads, tq=None, tk=None):
    B, S, D = x.shape
    assert D % num_heads == 0
    dh = D // num_heads

    # Sequence tiles: whole sequence for small S, 256-aligned tiles otherwise
    # (256 matches the v6e/v7x MXU; S-tiling bounds VMEM, and B * q_tiles "parallel"
    #  grid steps give the second TensorCore work even for small B).
    def _pick_tile(requested):
        if requested is not None:
            assert S % requested == 0
            return requested
        if S <= 256:
            return S
        for cand in (256, 128, 64, 32, 16, 8):
            if S % cand == 0:
                return cand
        return S

    tq = _pick_tile(tq)
    tk = _pick_tile(tk)

    f32 = jnp.float32
    bf16 = jnp.bfloat16

    # adaLN modulation hoisted out of the kernel: an M=B matmul runs fine in XLA and the
    # (D, 6D) weight (the biggest weight) never enters VMEM.
    t32 = t.astype(f32)
    silu_t = t32 * jax.nn.sigmoid(t32)
    ada = jnp.dot(silu_t, params["w_ada"].astype(f32)) + params["b_ada"].astype(f32)
    ada = ada.reshape(B, 6, D)             # rows: shift/scale/gate (mha), shift/scale/gate (mlp)

    mask3 = mask.astype(f32)[:, None, :]   # (B, 1, S)

    # Matmul weights in bf16 (f32 accumulation in-kernel), biases in f32; head-structured
    # tensors are pre-split OUTSIDE the kernel (free XLA reshapes).
    wq = params["wq"].astype(bf16)
    wk = params["wk"].astype(bf16)
    wv = params["wv"].astype(bf16)
    wo3 = params["wo"].reshape(num_heads, dh, D).astype(bf16)
    w1 = params["w1"].astype(bf16)
    w2 = params["w2"].astype(bf16)
    bq = params["bq"].astype(f32)
    bk = params["bk"].astype(f32)
    bv = params["bv"].astype(f32)
    bo = params["bo"].astype(f32)
    b1 = params["b1"].astype(f32)
    b2 = params["b2"].astype(f32)
    bias_k3 = params["bias_k"].reshape(num_heads, 1, dh).astype(f32)
    bias_v3 = params["bias_v"].reshape(num_heads, 1, dh).astype(f32)

    weights = [wq, bq, wk, bk, wv, bv, bias_k3, bias_v3, wo3, bo, w1, b1, w2, b2]

    grid = (B, S // tq, S // tk)
    kernel = functools.partial(_vamd_layer_kernel, num_heads=num_heads, head_dim=dh)

    x_q_spec = pl.BlockSpec((1, tq, D), lambda b, qi, ki: (b, qi, 0))
    x_kv_spec = pl.BlockSpec((1, tk, D), lambda b, qi, ki: (b, ki, 0))
    mask_spec = pl.BlockSpec((1, 1, tk), lambda b, qi, ki: (b, 0, ki))
    ada_spec = pl.BlockSpec((1, 6, D), lambda b, qi, ki: (b, 0, 0))
    out_spec = pl.BlockSpec((1, tq, D), lambda b, qi, ki: (b, qi, 0))

    # grid-invariant weights: constant index_map -> fetched once, never re-DMA'd
    weight_specs = [
        pl.BlockSpec(w.shape, (lambda b, qi, ki, _n=w.ndim: (0,) * _n)) for w in weights
    ]

    scratch = [
        pltpu.VMEM((num_heads, tq, dh), bf16),    # q, head-major (persists across kv tiles)
        pltpu.VMEM((num_heads, tk, dh), bf16),    # k tile, head-major
        pltpu.VMEM((num_heads, tk, dh), bf16),    # v tile, head-major
        pltpu.VMEM((num_heads, tq, 1), f32),      # online-softmax running max
        pltpu.VMEM((num_heads, tq, 1), f32),      # online-softmax running denominator
        pltpu.VMEM((num_heads, tq, dh), f32),     # online-softmax running numerator
    ]

    def _nbytes(a):
        return int(np.prod(a.shape)) * int(jnp.dtype(a.dtype).itemsize)

    weight_bytes = 2 * sum(_nbytes(w) for w in weights)               # (default double buf)
    stream_bytes = 2 * 4 * (tq * D + tk * D + tk + 6 * D + tq * D)    # double-buffered f32 blocks
    scratch_bytes = (num_heads * (tq + 2 * tk) * dh) * 2 + num_heads * tq * (dh + 2) * 4
    vmem_limit = int(min(64 * 2 ** 20,            # stay under v7x's 64 MiB physical VMEM
                         max(32 * 2 ** 20,        # generous floor (limit, not allocation)
                             2 * (weight_bytes + stream_bytes + scratch_bytes))))

    grid_spec = pltpu.PrefetchScalarGridSpec(
        num_scalar_prefetch=0,
        grid=grid,
        in_specs=[x_q_spec, x_kv_spec, mask_spec, ada_spec] + weight_specs,
        out_specs=out_spec,
        scratch_shapes=scratch,
    )

    call = pl.pallas_call(
        kernel,
        out_shape=jax.ShapeDtypeStruct((B, S, D), x.dtype),
        grid_spec=grid_spec,
        compiler_params=pltpu.CompilerParams(
            dimension_semantics=("parallel", "parallel", "arbitrary"),
            vmem_limit_bytes=vmem_limit,
        ),
    )
    xf = x.astype(f32)
    return call(xf, xf, mask3, ada, *weights)


def vamd_layer_ref(x, t, mask, params, *, num_heads):
    """Pure-JAX reference with identical semantics (sanity check)."""
    B, S, D = x.shape
    dh = D // num_heads

    silu_t = t * jax.nn.sigmoid(t)
    ada = silu_t @ params["w_ada"] + params["b_ada"]
    shift_mha, scale_mha, gate_mha, shift_mlp, scale_mlp, gate_mlp = jnp.split(ada, 6, axis=-1)

    h = _layernorm(x)
    h = h * (1.0 + scale_mha[:, None, :]) + shift_mha[:, None, :]

    q = (h @ params["wq"] + params["bq"]) * (1.0 / math.sqrt(dh))
    k = h @ params["wk"] + params["bk"]
    v = h @ params["wv"] + params["bv"]

    k_ext = jnp.concatenate([k, jnp.broadcast_to(params["bias_k"], (B, 1, D))], axis=1)
    v_ext = jnp.concatenate([v, jnp.broadcast_to(params["bias_v"], (B, 1, D))], axis=1)
    mask_ext = jnp.concatenate([mask, jnp.ones((B, 1), mask.dtype)], axis=1)

    qh = q.reshape(B, S, num_heads, dh).transpose(0, 2, 1, 3)
    kh = k_ext.reshape(B, S + 1, num_heads, dh).transpose(0, 2, 1, 3)
    vh = v_ext.reshape(B, S + 1, num_heads, dh).transpose(0, 2, 1, 3)

    scores = jnp.einsum("bhqd,bhkd->bhqk", qh, kh)
    scores = jnp.where(mask_ext[:, None, None, :] > 0.5, scores, NEG_INF)
    p = jax.nn.softmax(scores, axis=-1)
    ctx = jnp.einsum("bhqk,bhkd->bhqd", p, vh).transpose(0, 2, 1, 3).reshape(B, S, D)
    attn = ctx @ params["wo"] + params["bo"]
    x1 = x + gate_mha[:, None, :] * attn

    h2 = _layernorm(x1)
    h2 = h2 * (1.0 + scale_mlp[:, None, :]) + shift_mlp[:, None, :]
    h2 = _gelu(h2 @ params["w1"] + params["b1"]) @ params["w2"] + params["b2"]
    return x1 + gate_mlp[:, None, :] * h2


if __name__ == "__main__":
    B, S, D, H, F = 2, 8, 32, 4, 64   # batch, seq, embed_dim, mha_heads, ffn_embed_dim

    key = jax.random.PRNGKey(0)
    keys = jax.random.split(key, 20)

    def rnd(k, shape, scale=0.05):
        return (scale * jax.random.normal(k, shape)).astype(jnp.float32)

    params = {
        "w_ada": rnd(keys[0], (D, 6 * D)), "b_ada": rnd(keys[1], (1, 6 * D)),
        "wq": rnd(keys[2], (D, D)), "bq": rnd(keys[3], (1, D)),
        "wk": rnd(keys[4], (D, D)), "bk": rnd(keys[5], (1, D)),
        "wv": rnd(keys[6], (D, D)), "bv": rnd(keys[7], (1, D)),
        "bias_k": rnd(keys[8], (1, D)), "bias_v": rnd(keys[9], (1, D)),
        "wo": rnd(keys[10], (D, D)), "bo": rnd(keys[11], (1, D)),
        "w1": rnd(keys[12], (D, F)), "b1": rnd(keys[13], (1, F)),
        "w2": rnd(keys[14], (F, D)), "b2": rnd(keys[15], (1, D)),
    }

    x = jax.random.normal(keys[16], (B, S, D), dtype=jnp.float32)
    t = jax.random.normal(keys[17], (B, D), dtype=jnp.float32)
    mask = jnp.array(np.stack([np.concatenate([np.ones(6), np.zeros(2)]),
                               np.ones(8)]), dtype=jnp.float32)   # (B, S), 1 = valid

    out = jax.block_until_ready(vamd_layer(x, t, mask, params, num_heads=H))
    ref = jax.block_until_ready(vamd_layer_ref(x, t, mask, params, num_heads=H))

    assert out.shape == (B, S, D)
    np.testing.assert_allclose(np.asarray(out), np.asarray(ref), rtol=5e-2, atol=5e-2)
    print("KERNEL_OK")
</pallas_src>

<mosaic_0001>
module attributes {stable_mosaic.version = 11 : i64} {
  func.func @_vamd_layer_kernel(%arg0: i32, %arg1: i32, %arg2: i32, %arg3: memref<1x8x32xf32, #tpu.memory_space<vmem>>, %arg4: memref<1x8x32xf32, #tpu.memory_space<vmem>>, %arg5: memref<1x1x8xf32, #tpu.memory_space<vmem>>, %arg6: memref<1x6x32xf32, #tpu.memory_space<vmem>>, %arg7: memref<32x32xbf16, #tpu.memory_space<vmem>>, %arg8: memref<1x32xf32, #tpu.memory_space<vmem>>, %arg9: memref<32x32xbf16, #tpu.memory_space<vmem>>, %arg10: memref<1x32xf32, #tpu.memory_space<vmem>>, %arg11: memref<32x32xbf16, #tpu.memory_space<vmem>>, %arg12: memref<1x32xf32, #tpu.memory_space<vmem>>, %arg13: memref<4x1x8xf32, #tpu.memory_space<vmem>>, %arg14: memref<4x1x8xf32, #tpu.memory_space<vmem>>, %arg15: memref<4x8x32xbf16, #tpu.memory_space<vmem>>, %arg16: memref<1x32xf32, #tpu.memory_space<vmem>>, %arg17: memref<32x64xbf16, #tpu.memory_space<vmem>>, %arg18: memref<1x64xf32, #tpu.memory_space<vmem>>, %arg19: memref<64x32xbf16, #tpu.memory_space<vmem>>, %arg20: memref<1x32xf32, #tpu.memory_space<vmem>>, %arg21: memref<1x8x32xf32, #tpu.memory_space<vmem>>, %arg22: memref<4x8x8xbf16, #tpu.memory_space<vmem>>, %arg23: memref<4x8x8xbf16, #tpu.memory_space<vmem>>, %arg24: memref<4x8x8xbf16, #tpu.memory_space<vmem>>, %arg25: memref<4x8x1xf32, #tpu.memory_space<vmem>>, %arg26: memref<4x8x1xf32, #tpu.memory_space<vmem>>, %arg27: memref<4x8x8xf32, #tpu.memory_space<vmem>>) attributes {dimension_semantics = [#tpu.dimension_semantics<parallel>, #tpu.dimension_semantics<parallel>, #tpu.dimension_semantics<arbitrary>], iteration_bounds = array<i64: 2, 1, 1>, scalar_prefetch = 0 : i64, scratch_operands = 6 : i64, tpu.core_type = #tpu.core_type<tc>, window_params = [{transform_indices = @transform_0, window_bounds = array<i64: 1, 8, 32>}, {transform_indices = @transform_1, window_bounds = array<i64: 1, 8, 32>}, {transform_indices = @transform_2, window_bounds = array<i64: 1, 1, 8>}, {transform_indices = @transform_3, window_bounds = array<i64: 1, 6, 32>}, {pipeline_mode = #tpu.pipeline_mode<synchronous>, transform_indices = @transform_4, window_bounds = array<i64: 32, 32>}, {pipeline_mode = #tpu.pipeline_mode<synchronous>, transform_indices = @transform_5, window_bounds = array<i64: 1, 32>}, {pipeline_mode = #tpu.pipeline_mode<synchronous>, transform_indices = @transform_6, window_bounds = array<i64: 32, 32>}, {pipeline_mode = #tpu.pipeline_mode<synchronous>, transform_indices = @transform_7, window_bounds = array<i64: 1, 32>}, {pipeline_mode = #tpu.pipeline_mode<synchronous>, transform_indices = @transform_8, window_bounds = array<i64: 32, 32>}, {pipeline_mode = #tpu.pipeline_mode<synchronous>, transform_indices = @transform_9, window_bounds = array<i64: 1, 32>}, {pipeline_mode = #tpu.pipeline_mode<synchronous>, transform_indices = @transform_10, window_bounds = array<i64: 4, 1, 8>}, {pipeline_mode = #tpu.pipeline_mode<synchronous>, transform_indices = @transform_11, window_bounds = array<i64: 4, 1, 8>}, {pipeline_mode = #tpu.pipeline_mode<synchronous>, transform_indices = @transform_12, window_bounds = array<i64: 4, 8, 32>}, {pipeline_mode = #tpu.pipeline_mode<synchronous>, transform_indices = @transform_13, window_bounds = array<i64: 1, 32>}, {pipeline_mode = #tpu.pipeline_mode<synchronous>, transform_indices = @transform_14, window_bounds = array<i64: 32, 64>}, {pipeline_mode = #tpu.pipeline_mode<synchronous>, transform_indices = @transform_15, window_bounds = array<i64: 1, 64>}, {pipeline_mode = #tpu.pipeline_mode<synchronous>, transform_indices = @transform_16, window_bounds = array<i64: 64, 32>}, {pipeline_mode = #tpu.pipeline_mode<synchronous>, transform_indices = @transform_17, window_bounds = array<i64: 1, 32>}, {transform_indices = @transform_18, window_bounds = array<i64: 1, 8, 32>}]} {
    %c0 = arith.constant 0 : index
    %c0_0 = arith.constant 0 : index
    %c0_1 = arith.constant 0 : index
    %0 = vector.load %arg6[%c0, %c0_0, %c0_1] : memref<1x6x32xf32, #tpu.memory_space<vmem>>, vector<1x6x32xf32>
    %1 = vector.shape_cast %0 : vector<1x6x32xf32> to vector<6x32xf32>
    %2 = vector.extract_strided_slice %1 {offsets = [0, 0], sizes = [1, 32], strides = [1, 1]} : vector<6x32xf32> to vector<1x32xf32>
    %3 = vector.extract_strided_slice %1 {offsets = [1, 0], sizes = [1, 32], strides = [1, 1]} : vector<6x32xf32> to vector<1x32xf32>
    %4 = vector.extract_strided_slice %1 {offsets = [2, 0], sizes = [1, 32], strides = [1, 1]} : vector<6x32xf32> to vector<1x32xf32>
    %5 = vector.extract_strided_slice %1 {offsets = [3, 0], sizes = [1, 32], strides = [1, 1]} : vector<6x32xf32> to vector<1x32xf32>
    %6 = vector.extract_strided_slice %1 {offsets = [4, 0], sizes = [1, 32], strides = [1, 1]} : vector<6x32xf32> to vector<1x32xf32>
    %7 = vector.extract_strided_slice %1 {offsets = [5, 0], sizes = [1, 32], strides = [1, 1]} : vector<6x32xf32> to vector<1x32xf32>
    %c0_i32 = arith.constant 0 : i32
    %8 = arith.cmpi eq, %arg2, %c0_i32 : i32
    %9 = arith.extui %8 : i1 to i32
    %c0_i32_2 = arith.constant 0 : i32
    %10 = arith.cmpi ne, %9, %c0_i32_2 : i32
    scf.if %10 {
      %c0_81 = arith.constant 0 : index
      %c0_82 = arith.constant 0 : index
      %c0_83 = arith.constant 0 : index
      %128 = vector.load %arg3[%c0_81, %c0_82, %c0_83] : memref<1x8x32xf32, #tpu.memory_space<vmem>>, vector<1x8x32xf32>
      %129 = vector.shape_cast %128 : vector<1x8x32xf32> to vector<8x32xf32>
      %cst_84 = arith.constant dense<0.000000e+00> : vector<8xf32>
      %130 = vector.multi_reduction <add>, %129, %cst_84 [1] : vector<8x32xf32> to vector<8xf32>
      %131 = vector.shape_cast %130 : vector<8xf32> to vector<8x1xf32>
      %cst_85 = arith.constant 3.200000e+01 : f32
      %132 = vector.broadcast %cst_85 : f32 to vector<8x1xf32>
      %133 = arith.divf %131, %132 : vector<8x1xf32>
      %134 = vector.broadcast %133 : vector<8x1xf32> to vector<8x32xf32>
      %135 = arith.subf %129, %134 : vector<8x32xf32>
      %136 = arith.mulf %135, %135 : vector<8x32xf32>
      %cst_86 = arith.constant dense<0.000000e+00> : vector<8xf32>
      %137 = vector.multi_reduction <add>, %136, %cst_86 [1] : vector<8x32xf32> to vector<8xf32>
      %138 = vector.shape_cast %137 : vector<8xf32> to vector<8x1xf32>
      %cst_87 = arith.constant 3.200000e+01 : f32
      %139 = vector.broadcast %cst_87 : f32 to vector<8x1xf32>
      %140 = arith.divf %138, %139 : vector<8x1xf32>
      %141 = vector.broadcast %133 : vector<8x1xf32> to vector<8x32xf32>
      %142 = arith.subf %129, %141 : vector<8x32xf32>
      %cst_88 = arith.constant 9.99999997E-7 : f32
      %143 = vector.broadcast %cst_88 : f32 to vector<8x1xf32>
      %144 = arith.addf %140, %143 : vector<8x1xf32>
      %145 = math.rsqrt %144 : vector<8x1xf32>
      %146 = vector.broadcast %145 : vector<8x1xf32> to vector<8x32xf32>
      %147 = arith.mulf %142, %146 : vector<8x32xf32>
      %cst_89 = arith.constant 1.000000e+00 : f32
      %148 = vector.broadcast %cst_89 : f32 to vector<1x32xf32>
      %149 = arith.addf %148, %3 : vector<1x32xf32>
      %150 = vector.broadcast %149 : vector<1x32xf32> to vector<8x32xf32>
      %151 = arith.mulf %147, %150 : vector<8x32xf32>
      %152 = vector.broadcast %2 : vector<1x32xf32> to vector<8x32xf32>
      %153 = arith.addf %151, %152 : vector<8x32xf32>
      %154 = arith.truncf %153 : vector<8x32xf32> to vector<8x32xbf16>
      %c0_90 = arith.constant 0 : index
      %c0_91 = arith.constant 0 : index
      %155 = vector.load %arg7[%c0_90, %c0_91] : memref<32x32xbf16, #tpu.memory_space<vmem>>, vector<32x32xbf16>
      %cst_92 = arith.constant dense<0.000000e+00> : vector<8x32xf32>
      %156 = tpu.matmul %154, %155, %cst_92 {dimension_numbers = #tpu.dot_dimension_numbers<[1], [0], [0], [1], [0, 0, 1, 1], [], []>} : vector<8x32xbf16>, vector<32x32xbf16>, vector<8x32xf32> -> vector<8x32xf32>
      %c0_93 = arith.constant 0 : index
      %c0_94 = arith.constant 0 : index
      %157 = vector.load %arg8[%c0_93, %c0_94] : memref<1x32xf32, #tpu.memory_space<vmem>>, vector<1x32xf32>
      %158 = vector.broadcast %157 : vector<1x32xf32> to vector<8x32xf32>
      %159 = arith.addf %156, %158 : vector<8x32xf32>
      %cst_95 = arith.constant 0.353553385 : f32
      %160 = vector.broadcast %cst_95 : f32 to vector<8x32xf32>
      %161 = arith.mulf %159, %160 : vector<8x32xf32>
      %162 = vector.extract_strided_slice %161 {offsets = [0, 0], sizes = [8, 8], strides = [1, 1]} : vector<8x32xf32> to vector<8x8xf32>
      %163 = arith.truncf %162 : vector<8x8xf32> to vector<8x8xbf16>
      %c0_96 = arith.constant 0 : index
      %c0_97 = arith.constant 0 : index
      %c0_98 = arith.constant 0 : index
      %164 = vector.load %arg22[%c0_96, %c0_97, %c0_98] : memref<4x8x8xbf16, #tpu.memory_space<vmem>>, vector<1x8x8xbf16>
      %165 = vector.shape_cast %164 : vector<1x8x8xbf16> to vector<8x8xbf16>
      %166 = vector.shape_cast %163 : vector<8x8xbf16> to vector<1x8x8xbf16>
      tpu.vector_store %arg22[%c0_96, %c0_97, %c0_98], %166 {strides = array<i32>} : memref<4x8x8xbf16, #tpu.memory_space<vmem>>, vector<1x8x8xbf16>,
      %167 = vector.extract_strided_slice %161 {offsets = [0, 8], sizes = [8, 8], strides = [1, 1]} : vector<8x32xf32> to vector<8x8xf32>
      %168 = arith.truncf %167 : vector<8x8xf32> to vector<8x8xbf16>
      %c1_99 = arith.constant 1 : index
      %c0_100 = arith.constant 0 : index
      %c0_101 = arith.constant 0 : index
      %169 = vector.load %arg22[%c1_99, %c0_100, %c0_101] : memref<4x8x8xbf16, #tpu.memory_space<vmem>>, vector<1x8x8xbf16>
      %170 = vector.shape_cast %169 : vector<1x8x8xbf16> to vector<8x8xbf16>
      %171 = vector.shape_cast %168 : vector<8x8xbf16> to vector<1x8x8xbf16>
      tpu.vector_store %arg22[%c1_99, %c0_100, %c0_101], %171 {strides = array<i32>} : memref<4x8x8xbf16, #tpu.memory_space<vmem>>, vector<1x8x8xbf16>,
      %172 = vector.extract_strided_slice %161 {offsets = [0, 16], sizes = [8, 8], strides = [1, 1]} : vector<8x32xf32> to vector<8x8xf32>
      %173 = arith.truncf %172 : vector<8x8xf32> to vector<8x8xbf16>
      %c2_102 = arith.constant 2 : index
      %c0_103 = arith.constant 0 : index
      %c0_104 = arith.constant 0 : index
      %174 = vector.load %arg22[%c2_102, %c0_103, %c0_104] : memref<4x8x8xbf16, #tpu.memory_space<vmem>>, vector<1x8x8xbf16>
      %175 = vector.shape_cast %174 : vector<1x8x8xbf16> to vector<8x8xbf16>
      %176 = vector.shape_cast %173 : vector<8x8xbf16> to vector<1x8x8xbf16>
      tpu.vector_store %arg22[%c2_102, %c0_103, %c0_104], %176 {strides = array<i32>} : memref<4x8x8xbf16, #tpu.memory_space<vmem>>, vector<1x8x8xbf16>,
      %177 = vector.extract_strided_slice %161 {offsets = [0, 24], sizes = [8, 8], strides = [1, 1]} : vector<8x32xf32> to vector<8x8xf32>
      %178 = arith.truncf %177 : vector<8x8xf32> to vector<8x8xbf16>
      %c3_105 = arith.constant 3 : index
      %c0_106 = arith.constant 0 : index
      %c0_107 = arith.constant 0 : index
      %179 = vector.load %arg22[%c3_105, %c0_106, %c0_107] : memref<4x8x8xbf16, #tpu.memory_space<vmem>>, vector<1x8x8xbf16>
      %180 = vector.shape_cast %179 : vector<1x8x8xbf16> to vector<8x8xbf16>
      %181 = vector.shape_cast %178 : vector<8x8xbf16> to vector<1x8x8xbf16>
      tpu.vector_store %arg22[%c3_105, %c0_106, %c0_107], %181 {strides = array<i32>} : memref<4x8x8xbf16, #tpu.memory_space<vmem>>, vector<1x8x8xbf16>,
      %c0_108 = arith.constant 0 : index
      %c0_109 = arith.constant 0 : index
      %c0_110 = arith.constant 0 : index
      %182 = vector.load %arg22[%c0_108, %c0_109, %c0_110] : memref<4x8x8xbf16, #tpu.memory_space<vmem>>, vector<4x8x8xbf16>
      %183 = arith.extf %182 : vector<4x8x8xbf16> to vector<4x8x8xf32>
      %c0_111 = arith.constant 0 : index
      %c0_112 = arith.constant 0 : index
      %c0_113 = arith.constant 0 : index
      %184 = vector.load %arg13[%c0_111, %c0_112, %c0_113] : memref<4x1x8xf32, #tpu.memory_space<vmem>>, vector<4x1x8xf32>
      %185 = vector.broadcast %184 : vector<4x1x8xf32> to vector<4x8x8xf32>
      %186 = arith.mulf %183, %185 : vector<4x8x8xf32>
      %cst_114 = arith.constant dense<0.000000e+00> : vector<4x8xf32>
      %187 = vector.multi_reduction <add>, %186, %cst_114 [2] : vector<4x8x8xf32> to vector<4x8xf32>
      %188 = vector.shape_cast %187 : vector<4x8xf32> to vector<4x8x1xf32>
      %c0_115 = arith.constant 0 : index
      %c0_116 = arith.constant 0 : index
      %c0_117 = arith.constant 0 : index
      %189 = vector.load %arg25[%c0_115, %c0_116, %c0_117] : memref<4x8x1xf32, #tpu.memory_space<vmem>>, vector<4x8x1xf32>
      tpu.vector_store %arg25[%c0_115, %c0_116, %c0_117], %188 {strides = array<i32>} : memref<4x8x1xf32, #tpu.memory_space<vmem>>, vector<4x8x1xf32>,
      %cst_118 = arith.constant 1.000000e+00 : f32
      %190 = vector.broadcast %cst_118 : f32 to vector<4x8x1xf32>
      %c0_119 = arith.constant 0 : index
      %c0_120 = arith.constant 0 : index
      %c0_121 = arith.constant 0 : index
      %191 = vector.load %arg26[%c0_119, %c0_120, %c0_121] : memref<4x8x1xf32, #tpu.memory_space<vmem>>, vector<4x8x1xf32>
      tpu.vector_store %arg26[%c0_119, %c0_120, %c0_121], %190 {strides = array<i32>} : memref<4x8x1xf32, #tpu.memory_space<vmem>>, vector<4x8x1xf32>,
      %c0_122 = arith.constant 0 : index
      %c0_123 = arith.constant 0 : index
      %c0_124 = arith.constant 0 : index
      %192 = vector.load %arg14[%c0_122, %c0_123, %c0_124] : memref<4x1x8xf32, #tpu.memory_space<vmem>>, vector<4x1x8xf32>
      %193 = vector.shape_cast %192 : vector<4x1x8xf32> to vector<4x1x8xf32>
      %194 = vector.broadcast %193 : vector<4x1x8xf32> to vector<4x8x8xf32>
      %c0_125 = arith.constant 0 : index
      %c0_126 = arith.constant 0 : index
      %c0_127 = arith.constant 0 : index
      %195 = vector.load %arg27[%c0_125, %c0_126, %c0_127] : memref<4x8x8xf32, #tpu.memory_space<vmem>>, vector<4x8x8xf32>
      tpu.vector_store %arg27[%c0_125, %c0_126, %c0_127], %194 {strides = array<i32>} : memref<4x8x8xf32, #tpu.memory_space<vmem>>, vector<4x8x8xf32>,
    } else {
    }
    %c0_3 = arith.constant 0 : index
    %c0_4 = arith.constant 0 : index
    %c0_5 = arith.constant 0 : index
    %11 = vector.load %arg4[%c0_3, %c0_4, %c0_5] : memref<1x8x32xf32, #tpu.memory_space<vmem>>, vector<1x8x32xf32>
    %12 = vector.shape_cast %11 : vector<1x8x32xf32> to vector<8x32xf32>
    %cst = arith.constant dense<0.000000e+00> : vector<8xf32>
    %13 = vector.multi_reduction <add>, %12, %cst [1] : vector<8x32xf32> to vector<8xf32>
    %14 = vector.shape_cast %13 : vector<8xf32> to vector<8x1xf32>
    %cst_6 = arith.constant 3.200000e+01 : f32
    %15 = vector.broadcast %cst_6 : f32 to vector<8x1xf32>
    %16 = arith.divf %14, %15 : vector<8x1xf32>
    %17 = vector.broadcast %16 : vector<8x1xf32> to vector<8x32xf32>
    %18 = arith.subf %12, %17 : vector<8x32xf32>
    %19 = arith.mulf %18, %18 : vector<8x32xf32>
    %cst_7 = arith.constant dense<0.000000e+00> : vector<8xf32>
    %20 = vector.multi_reduction <add>, %19, %cst_7 [1] : vector<8x32xf32> to vector<8xf32>
    %21 = vector.shape_cast %20 : vector<8xf32> to vector<8x1xf32>
    %cst_8 = arith.constant 3.200000e+01 : f32
    %22 = vector.broadcast %cst_8 : f32 to vector<8x1xf32>
    %23 = arith.divf %21, %22 : vector<8x1xf32>
    %24 = vector.broadcast %16 : vector<8x1xf32> to vector<8x32xf32>
    %25 = arith.subf %12, %24 : vector<8x32xf32>
    %cst_9 = arith.constant 9.99999997E-7 : f32
    %26 = vector.broadcast %cst_9 : f32 to vector<8x1xf32>
    %27 = arith.addf %23, %26 : vector<8x1xf32>
    %28 = math.rsqrt %27 : vector<8x1xf32>
    %29 = vector.broadcast %28 : vector<8x1xf32> to vector<8x32xf32>
    %30 = arith.mulf %25, %29 : vector<8x32xf32>
    %cst_10 = arith.constant 1.000000e+00 : f32
    %31 = vector.broadcast %cst_10 : f32 to vector<1x32xf32>
    %32 = arith.addf %31, %3 : vector<1x32xf32>
    %33 = vector.broadcast %32 : vector<1x32xf32> to vector<8x32xf32>
    %34 = arith.mulf %30, %33 : vector<8x32xf32>
    %35 = vector.broadcast %2 : vector<1x32xf32> to vector<8x32xf32>
    %36 = arith.addf %34, %35 : vector<8x32xf32>
    %37 = arith.truncf %36 : vector<8x32xf32> to vector<8x32xbf16>
    %c0_11 = arith.constant 0 : index
    %c0_12 = arith.constant 0 : index
    %38 = vector.load %arg9[%c0_11, %c0_12] : memref<32x32xbf16, #tpu.memory_space<vmem>>, vector<32x32xbf16>
    %cst_13 = arith.constant dense<0.000000e+00> : vector<8x32xf32>
    %39 = tpu.matmul %37, %38, %cst_13 {dimension_numbers = #tpu.dot_dimension_numbers<[1], [0], [0], [1], [0, 0, 1, 1], [], []>} : vector<8x32xbf16>, vector<32x32xbf16>, vector<8x32xf32> -> vector<8x32xf32>
    %c0_14 = arith.constant 0 : index
    %c0_15 = arith.constant 0 : index
    %40 = vector.load %arg10[%c0_14, %c0_15] : memref<1x32xf32, #tpu.memory_space<vmem>>, vector<1x32xf32>
    %41 = vector.broadcast %40 : vector<1x32xf32> to vector<8x32xf32>
    %42 = arith.addf %39, %41 : vector<8x32xf32>
    %c0_16 = arith.constant 0 : index
    %c0_17 = arith.constant 0 : index
    %43 = vector.load %arg11[%c0_16, %c0_17] : memref<32x32xbf16, #tpu.memory_space<vmem>>, vector<32x32xbf16>
    %cst_18 = arith.constant dense<0.000000e+00> : vector<8x32xf32>
    %44 = tpu.matmul %37, %43, %cst_18 {dimension_numbers = #tpu.dot_dimension_numbers<[1], [0], [0], [1], [0, 0, 1, 1], [], []>} : vector<8x32xbf16>, vector<32x32xbf16>, vector<8x32xf32> -> vector<8x32xf32>
    %c0_19 = arith.constant 0 : index
    %c0_20 = arith.constant 0 : index
    %45 = vector.load %arg12[%c0_19, %c0_20] : memref<1x32xf32, #tpu.memory_space<vmem>>, vector<1x32xf32>
    %46 = vector.broadcast %45 : vector<1x32xf32> to vector<8x32xf32>
    %47 = arith.addf %44, %46 : vector<8x32xf32>
    %48 = vector.extract_strided_slice %42 {offsets = [0, 0], sizes = [8, 8], strides = [1, 1]} : vector<8x32xf32> to vector<8x8xf32>
    %49 = arith.truncf %48 : vector<8x8xf32> to vector<8x8xbf16>
    %c0_21 = arith.constant 0 : index
    %c0_22 = arith.constant 0 : index
    %c0_23 = arith.constant 0 : index
    %50 = vector.load %arg23[%c0_21, %c0_22, %c0_23] : memref<4x8x8xbf16, #tpu.memory_space<vmem>>, vector<1x8x8xbf16>
    %51 = vector.shape_cast %50 : vector<1x8x8xbf16> to vector<8x8xbf16>
    %52 = vector.shape_cast %49 : vector<8x8xbf16> to vector<1x8x8xbf16>
    tpu.vector_store %arg23[%c0_21, %c0_22, %c0_23], %52 {strides = array<i32>} : memref<4x8x8xbf16, #tpu.memory_space<vmem>>, vector<1x8x8xbf16>,
    %53 = vector.extract_strided_slice %47 {offsets = [0, 0], sizes = [8, 8], strides = [1, 1]} : vector<8x32xf32> to vector<8x8xf32>
    %54 = arith.truncf %53 : vector<8x8xf32> to vector<8x8xbf16>
    %c0_24 = arith.constant 0 : index
    %c0_25 = arith.constant 0 : index
    %c0_26 = arith.constant 0 : index
    %55 = vector.load %arg24[%c0_24, %c0_25, %c0_26] : memref<4x8x8xbf16, #tpu.memory_space<vmem>>, vector<1x8x8xbf16>
    %56 = vector.shape_cast %55 : vector<1x8x8xbf16> to vector<8x8xbf16>
    %57 = vector.shape_cast %54 : vector<8x8xbf16> to vector<1x8x8xbf16>
    tpu.vector_store %arg24[%c0_24, %c0_25, %c0_26], %57 {strides = array<i32>} : memref<4x8x8xbf16, #tpu.memory_space<vmem>>, vector<1x8x8xbf16>,
    %58 = vector.extract_strided_slice %42 {offsets = [0, 8], sizes = [8, 8], strides = [1, 1]} : vector<8x32xf32> to vector<8x8xf32>
    %59 = arith.truncf %58 : vector<8x8xf32> to vector<8x8xbf16>
    %c1 = arith.constant 1 : index
    %c0_27 = arith.constant 0 : index
    %c0_28 = arith.constant 0 : index
    %60 = vector.load %arg23[%c1, %c0_27, %c0_28] : memref<4x8x8xbf16, #tpu.memory_space<vmem>>, vector<1x8x8xbf16>
    %61 = vector.shape_cast %60 : vector<1x8x8xbf16> to vector<8x8xbf16>
    %62 = vector.shape_cast %59 : vector<8x8xbf16> to vector<1x8x8xbf16>
    tpu.vector_store %arg23[%c1, %c0_27, %c0_28], %62 {strides = array<i32>} : memref<4x8x8xbf16, #tpu.memory_space<vmem>>, vector<1x8x8xbf16>,
    %63 = vector.extract_strided_slice %47 {offsets = [0, 8], sizes = [8, 8], strides = [1, 1]} : vector<8x32xf32> to vector<8x8xf32>
    %64 = arith.truncf %63 : vector<8x8xf32> to vector<8x8xbf16>
    %c1_29 = arith.constant 1 : index
    %c0_30 = arith.constant 0 : index
    %c0_31 = arith.constant 0 : index
    %65 = vector.load %arg24[%c1_29, %c0_30, %c0_31] : memref<4x8x8xbf16, #tpu.memory_space<vmem>>, vector<1x8x8xbf16>
    %66 = vector.shape_cast %65 : vector<1x8x8xbf16> to vector<8x8xbf16>
    %67 = vector.shape_cast %64 : vector<8x8xbf16> to vector<1x8x8xbf16>
    tpu.vector_store %arg24[%c1_29, %c0_30, %c0_31], %67 {strides = array<i32>} : memref<4x8x8xbf16, #tpu.memory_space<vmem>>, vector<1x8x8xbf16>,
    %68 = vector.extract_strided_slice %42 {offsets = [0, 16], sizes = [8, 8], strides = [1, 1]} : vector<8x32xf32> to vector<8x8xf32>
    %69 = arith.truncf %68 : vector<8x8xf32> to vector<8x8xbf16>
    %c2 = arith.constant 2 : index
    %c0_32 = arith.constant 0 : index
    %c0_33 = arith.constant 0 : index
    %70 = vector.load %arg23[%c2, %c0_32, %c0_33] : memref<4x8x8xbf16, #tpu.memory_space<vmem>>, vector<1x8x8xbf16>
    %71 = vector.shape_cast %70 : vector<1x8x8xbf16> to vector<8x8xbf16>
    %72 = vector.shape_cast %69 : vector<8x8xbf16> to vector<1x8x8xbf16>
    tpu.vector_store %arg23[%c2, %c0_32, %c0_33], %72 {strides = array<i32>} : memref<4x8x8xbf16, #tpu.memory_space<vmem>>, vector<1x8x8xbf16>,
    %73 = vector.extract_strided_slice %47 {offsets = [0, 16], sizes = [8, 8], strides = [1, 1]} : vector<8x32xf32> to vector<8x8xf32>
    %74 = arith.truncf %73 : vector<8x8xf32> to vector<8x8xbf16>
    %c2_34 = arith.constant 2 : index
    %c0_35 = arith.constant 0 : index
    %c0_36 = arith.constant 0 : index
    %75 = vector.load %arg24[%c2_34, %c0_35, %c0_36] : memref<4x8x8xbf16, #tpu.memory_space<vmem>>, vector<1x8x8xbf16>
    %76 = vector.shape_cast %75 : vector<1x8x8xbf16> to vector<8x8xbf16>
    %77 = vector.shape_cast %74 : vector<8x8xbf16> to vector<1x8x8xbf16>
    tpu.vector_store %arg24[%c2_34, %c0_35, %c0_36], %77 {strides = array<i32>} : memref<4x8x8xbf16, #tpu.memory_space<vmem>>, vector<1x8x8xbf16>,
    %78 = vector.extract_strided_slice %42 {offsets = [0, 24], sizes = [8, 8], strides = [1, 1]} : vector<8x32xf32> to vector<8x8xf32>
    %79 = arith.truncf %78 : vector<8x8xf32> to vector<8x8xbf16>
    %c3 = arith.constant 3 : index
    %c0_37 = arith.constant 0 : index
    %c0_38 = arith.constant 0 : index
    %80 = vector.load %arg23[%c3, %c0_37, %c0_38] : memref<4x8x8xbf16, #tpu.memory_space<vmem>>, vector<1x8x8xbf16>
    %81 = vector.shape_cast %80 : vector<1x8x8xbf16> to vector<8x8xbf16>
    %82 = vector.shape_cast %79 : vector<8x8xbf16> to vector<1x8x8xbf16>
    tpu.vector_store %arg23[%c3, %c0_37, %c0_38], %82 {strides = array<i32>} : memref<4x8x8xbf16, #tpu.memory_space<vmem>>, vector<1x8x8xbf16>,
    %83 = vector.extract_strided_slice %47 {offsets = [0, 24], sizes = [8, 8], strides = [1, 1]} : vector<8x32xf32> to vector<8x8xf32>
    %84 = arith.truncf %83 : vector<8x8xf32> to vector<8x8xbf16>
    %c3_39 = arith.constant 3 : index
    %c0_40 = arith.constant 0 : index
    %c0_41 = arith.constant 0 : index
    %85 = vector.load %arg24[%c3_39, %c0_40, %c0_41] : memref<4x8x8xbf16, #tpu.memory_space<vmem>>, vector<1x8x8xbf16>
    %86 = vector.shape_cast %85 : vector<1x8x8xbf16> to vector<8x8xbf16>
    %87 = vector.shape_cast %84 : vector<8x8xbf16> to vector<1x8x8xbf16>
    tpu.vector_store %arg24[%c3_39, %c0_40, %c0_41], %87 {strides = array<i32>} : memref<4x8x8xbf16, #tpu.memory_space<vmem>>, vector<1x8x8xbf16>,
    %c0_42 = arith.constant 0 : index
    %c0_43 = arith.constant 0 : index
    %c0_44 = arith.constant 0 : index
    %88 = vector.load %arg5[%c0_42, %c0_43, %c0_44] : memref<1x1x8xf32, #tpu.memory_space<vmem>>, vector<1x1x8xf32>
    %89 = vector.shape_cast %88 : vector<1x1x8xf32> to vector<1x8xf32>
    %cst_45 = arith.constant 5.000000e-01 : f32
    %90 = vector.broadcast %cst_45 : f32 to vector<1x8xf32>
    %91 = arith.cmpf ogt, %89, %90 : vector<1x8xf32>
    %cst_46 = arith.constant 0.000000e+00 : f32
    %cst_47 = arith.constant -1.000000e+30 : f32
    %92 = vector.broadcast %cst_46 : f32 to vector<1x8xf32>
    %93 = vector.broadcast %cst_47 : f32 to vector<1x8xf32>
    %94 = arith.select %91, %92, %93 : vector<1x8xi1>, vector<1x8xf32>
    %c0_48 = arith.constant 0 : index
    %c0_49 = arith.constant 0 : index
    %c0_50 = arith.constant 0 : index
    %95 = vector.load %arg22[%c0_48, %c0_49, %c0_50] : memref<4x8x8xbf16, #tpu.memory_space<vmem>>, vector<4x8x8xbf16>
    %c0_51 = arith.constant 0 : index
    %c0_52 = arith.constant 0 : index
    %c0_53 = arith.constant 0 : index
    %96 = vector.load %arg23[%c0_51, %c0_52, %c0_53] : memref<4x8x8xbf16, #tpu.memory_space<vmem>>, vector<4x8x8xbf16>
    "tpu.trace_start"() <{level = 10 : i32, message = "hqd,hkd->hqk"}> : () -> ()
    %cst_54 = arith.constant dense<0.000000e+00> : vector<4x8x8xf32>
    %97 = tpu.matmul %95, %96, %cst_54 {dimension_numbers = #tpu.dot_dimension_numbers<[2], [2], [1], [1], [0, 0, 0, 1, 1, 1], [0], [0]>} : vector<4x8x8xbf16>, vector<4x8x8xbf16>, vector<4x8x8xf32> -> vector<4x8x8xf32>
    "tpu.trace_stop"() : () -> ()
    %98 = vector.shape_cast %94 : vector<1x8xf32> to vector<1x1x8xf32>
    %99 = vector.broadcast %98 : vector<1x1x8xf32> to vector<4x8x8xf32>
    %100 = arith.addf %97, %99 : vector<4x8x8xf32>
    %c0_55 = arith.constant 0 : index
    %c0_56 = arith.constant 0 : index
    %c0_57 = arith.constant 0 : index
    %101 = vector.load %arg25[%c0_55, %c0_56, %c0_57] : memref<4x8x1xf32, #tpu.memory_space<vmem>>, vector<4x8x1xf32>
    %cst_58 = arith.constant dense<0xFF800000> : vector<4x8xf32>
    %102 = vector.multi_reduction <maximumf>, %100, %cst_58 [2] : vector<4x8x8xf32> to vector<4x8xf32>
    %103 = vector.shape_cast %102 : vector<4x8xf32> to vector<4x8x1xf32>
    %104 = arith.maximumf %101, %103 : vector<4x8x1xf32>
    %105 = arith.subf %101, %104 : vector<4x8x1xf32>
    %106 = math.exp %105 : vector<4x8x1xf32>
    %107 = vector.broadcast %104 : vector<4x8x1xf32> to vector<4x8x8xf32>
    %108 = arith.subf %100, %107 : vector<4x8x8xf32>
    %109 = math.exp %108 : vector<4x8x8xf32>
    %c0_59 = arith.constant 0 : index
    %c0_60 = arith.constant 0 : index
    %c0_61 = arith.constant 0 : index
    %110 = vector.load %arg26[%c0_59, %c0_60, %c0_61] : memref<4x8x1xf32, #tpu.memory_space<vmem>>, vector<4x8x1xf32>
    %111 = arith.mulf %106, %110 : vector<4x8x1xf32>
    %cst_62 = arith.constant dense<0.000000e+00> : vector<4x8xf32>
    %112 = vector.multi_reduction <add>, %109, %cst_62 [2] : vector<4x8x8xf32> to vector<4x8xf32>
    %113 = vector.shape_cast %112 : vector<4x8xf32> to vector<4x8x1xf32>
    %114 = arith.addf %111, %113 : vector<4x8x1xf32>
    %c0_63 = arith.constant 0 : index
    %c0_64 = arith.constant 0 : index
    %c0_65 = arith.constant 0 : index
    %115 = vector.load %arg26[%c0_63, %c0_64, %c0_65] : memref<4x8x1xf32, #tpu.memory_space<vmem>>, vector<4x8x1xf32>
    tpu.vector_store %arg26[%c0_63, %c0_64, %c0_65], %114 {strides = array<i32>} : memref<4x8x1xf32, #tpu.memory_space<vmem>>, vector<4x8x1xf32>,
    %c0_66 = arith.constant 0 : index
    %c0_67 = arith.constant 0 : index
    %c0_68 = arith.constant 0 : index
    %116 = vector.load %arg27[%c0_66, %c0_67, %c0_68] : memref<4x8x8xf32, #tpu.memory_space<vmem>>, vector<4x8x8xf32>
    %117 = vector.broadcast %106 : vector<4x8x1xf32> to vector<4x8x8xf32>
    %118 = arith.mulf %117, %116 : vector<4x8x8xf32>
    %119 = arith.truncf %109 : vector<4x8x8xf32> to vector<4x8x8xbf16>
    %c0_69 = arith.constant 0 : index
    %c0_70 = arith.constant 0 : index
    %c0_71 = arith.constant 0 : index
    %120 = vector.load %arg24[%c0_69, %c0_70, %c0_71] : memref<4x8x8xbf16, #tpu.memory_space<vmem>>, vector<4x8x8xbf16>
    "tpu.trace_start"() <{level = 10 : i32, message = "hqk,hkd->hqd"}> : () -> ()
    %cst_72 = arith.constant dense<0.000000e+00> : vector<4x8x8xf32>
    %121 = tpu.matmul %119, %120, %cst_72 {dimension_numbers = #tpu.dot_dimension_numbers<[2], [1], [1], [2], [0, 0, 0, 1, 1, 2], [0], [0]>} : vector<4x8x8xbf16>, vector<4x8x8xbf16>, vector<4x8x8xf32> -> vector<4x8x8xf32>
    "tpu.trace_stop"() : () -> ()
    %122 = arith.addf %118, %121 : vector<4x8x8xf32>
    %c0_73 = arith.constant 0 : index
    %c0_74 = arith.constant 0 : index
    %c0_75 = arith.constant 0 : index
    %123 = vector.load %arg27[%c0_73, %c0_74, %c0_75] : memref<4x8x8xf32, #tpu.memory_space<vmem>>, vector<4x8x8xf32>
    tpu.vector_store %arg27[%c0_73, %c0_74, %c0_75], %122 {strides = array<i32>} : memref<4x8x8xf32, #tpu.memory_space<vmem>>, vector<4x8x8xf32>,
    %c0_76 = arith.constant 0 : index
    %c0_77 = arith.constant 0 : index
    %c0_78 = arith.constant 0 : index
    %124 = vector.load %arg25[%c0_76, %c0_77, %c0_78] : memref<4x8x1xf32, #tpu.memory_space<vmem>>, vector<4x8x1xf32>
    tpu.vector_store %arg25[%c0_76, %c0_77, %c0_78], %104 {strides = array<i32>} : memref<4x8x1xf32, #tpu.memory_space<vmem>>, vector<4x8x1xf32>,
    %c0_i32_79 = arith.constant 0 : i32
    %125 = arith.cmpi eq, %arg2, %c0_i32_79 : i32
    %126 = arith.extui %125 : i1 to i32
    %c0_i32_80 = arith.constant 0 : i32
    %127 = arith.cmpi ne, %126, %c0_i32_80 : i32
    scf.if %127 {
      %c0_81 = arith.constant 0 : index
      %c0_82 = arith.constant 0 : index
      %c0_83 = arith.constant 0 : index
      %128 = vector.load %arg26[%c0_81, %c0_82, %c0_83] : memref<4x8x1xf32, #tpu.memory_space<vmem>>, vector<4x8x1xf32>
      %129 = tpu.reciprocal %128 {approx = true} : vector<4x8x1xf32> -> vector<4x8x1xf32>
      %cst_84 = arith.constant 0.000000e+00 : f32
      %130 = vector.broadcast %cst_84 : f32 to vector<8x32xf32>
      %c0_85 = arith.constant 0 : index
      %c0_86 = arith.constant 0 : index
      %c0_87 = arith.constant 0 : index
      %131 = vector.load %arg27[%c0_85, %c0_86, %c0_87] : memref<4x8x8xf32, #tpu.memory_space<vmem>>, vector<1x8x8xf32>
      %132 = vector.shape_cast %131 : vector<1x8x8xf32> to vector<8x8xf32>
      %133 = vector.extract_strided_slice %129 {offsets = [0, 0, 0], sizes = [1, 8, 1], strides = [1, 1, 1]} : vector<4x8x1xf32> to vector<1x8x1xf32>
      %134 = vector.shape_cast %133 : vector<1x8x1xf32> to vector<8x1xf32>
      %135 = vector.broadcast %134 : vector<8x1xf32> to vector<8x8xf32>
      %136 = arith.mulf %132, %135 : vector<8x8xf32>
      %137 = arith.truncf %136 : vector<8x8xf32> to vector<8x8xbf16>
      %c0_88 = arith.constant 0 : index
      %c0_89 = arith.constant 0 : index
      %c0_90 = arith.constant 0 : index
      %138 = vector.load %arg15[%c0_88, %c0_89, %c0_90] : memref<4x8x32xbf16, #tpu.memory_space<vmem>>, vector<1x8x32xbf16>
      %139 = vector.shape_cast %138 : vector<1x8x32xbf16> to vector<8x32xbf16>
      %cst_91 = arith.constant dense<0.000000e+00> : vector<8x32xf32>
      %140 = tpu.matmul %137, %139, %cst_91 {dimension_numbers = #tpu.dot_dimension_numbers<[1], [0], [0], [1], [0, 0, 1, 1], [], []>} : vector<8x8xbf16>, vector<8x32xbf16>, vector<8x32xf32> -> vector<8x32xf32>
      %141 = arith.addf %130, %140 : vector<8x32xf32>
      %c1_92 = arith.constant 1 : index
      %c0_93 = arith.constant 0 : index
      %c0_94 = arith.constant 0 : index
      %142 = vector.load %arg27[%c1_92, %c0_93, %c0_94] : memref<4x8x8xf32, #tpu.memory_space<vmem>>, vector<1x8x8xf32>
      %143 = vector.shape_cast %142 : vector<1x8x8xf32> to vector<8x8xf32>
      %144 = vector.extract_strided_slice %129 {offsets = [1, 0, 0], sizes = [1, 8, 1], strides = [1, 1, 1]} : vector<4x8x1xf32> to vector<1x8x1xf32>
      %145 = vector.shape_cast %144 : vector<1x8x1xf32> to vector<8x1xf32>
      %146 = vector.broadcast %145 : vector<8x1xf32> to vector<8x8xf32>
      %147 = arith.mulf %143, %146 : vector<8x8xf32>
      %148 = arith.truncf %147 : vector<8x8xf32> to vector<8x8xbf16>
      %c1_95 = arith.constant 1 : index
      %c0_96 = arith.constant 0 : index
      %c0_97 = arith.constant 0 : index
      %149 = vector.load %arg15[%c1_95, %c0_96, %c0_97] : memref<4x8x32xbf16, #tpu.memory_space<vmem>>, vector<1x8x32xbf16>
      %150 = vector.shape_cast %149 : vector<1x8x32xbf16> to vector<8x32xbf16>
      %cst_98 = arith.constant dense<0.000000e+00> : vector<8x32xf32>
      %151 = tpu.matmul %148, %150, %cst_98 {dimension_numbers = #tpu.dot_dimension_numbers<[1], [0], [0], [1], [0, 0, 1, 1], [], []>} : vector<8x8xbf16>, vector<8x32xbf16>, vector<8x32xf32> -> vector<8x32xf32>
      %152 = arith.addf %141, %151 : vector<8x32xf32>
      %c2_99 = arith.constant 2 : index
      %c0_100 = arith.constant 0 : index
      %c0_101 = arith.constant 0 : index
      %153 = vector.load %arg27[%c2_99, %c0_100, %c0_101] : memref<4x8x8xf32, #tpu.memory_space<vmem>>, vector<1x8x8xf32>
      %154 = vector.shape_cast %153 : vector<1x8x8xf32> to vector<8x8xf32>
      %155 = vector.extract_strided_slice %129 {offsets = [2, 0, 0], sizes = [1, 8, 1], strides = [1, 1, 1]} : vector<4x8x1xf32> to vector<1x8x1xf32>
      %156 = vector.shape_cast %155 : vector<1x8x1xf32> to vector<8x1xf32>
      %157 = vector.broadcast %156 : vector<8x1xf32> to vector<8x8xf32>
      %158 = arith.mulf %154, %157 : vector<8x8xf32>
      %159 = arith.truncf %158 : vector<8x8xf32> to vector<8x8xbf16>
      %c2_102 = arith.constant 2 : index
      %c0_103 = arith.constant 0 : index
      %c0_104 = arith.constant 0 : index
      %160 = vector.load %arg15[%c2_102, %c0_103, %c0_104] : memref<4x8x32xbf16, #tpu.memory_space<vmem>>, vector<1x8x32xbf16>
      %161 = vector.shape_cast %160 : vector<1x8x32xbf16> to vector<8x32xbf16>
      %cst_105 = arith.constant dense<0.000000e+00> : vector<8x32xf32>
      %162 = tpu.matmul %159, %161, %cst_105 {dimension_numbers = #tpu.dot_dimension_numbers<[1], [0], [0], [1], [0, 0, 1, 1], [], []>} : vector<8x8xbf16>, vector<8x32xbf16>, vector<8x32xf32> -> vector<8x32xf32>
      %163 = arith.addf %152, %162 : vector<8x32xf32>
      %c3_106 = arith.constant 3 : index
      %c0_107 = arith.constant 0 : index
      %c0_108 = arith.constant 0 : index
      %164 = vector.load %arg27[%c3_106, %c0_107, %c0_108] : memref<4x8x8xf32, #tpu.memory_space<vmem>>, vector<1x8x8xf32>
      %165 = vector.shape_cast %164 : vector<1x8x8xf32> to vector<8x8xf32>
      %166 = vector.extract_strided_slice %129 {offsets = [3, 0, 0], sizes = [1, 8, 1], strides = [1, 1, 1]} : vector<4x8x1xf32> to vector<1x8x1xf32>
      %167 = vector.shape_cast %166 : vector<1x8x1xf32> to vector<8x1xf32>
      %168 = vector.broadcast %167 : vector<8x1xf32> to vector<8x8xf32>
      %169 = arith.mulf %165, %168 : vector<8x8xf32>
      %170 = arith.truncf %169 : vector<8x8xf32> to vector<8x8xbf16>
      %c3_109 = arith.constant 3 : index
      %c0_110 = arith.constant 0 : index
      %c0_111 = arith.constant 0 : index
      %171 = vector.load %arg15[%c3_109, %c0_110, %c0_111] : memref<4x8x32xbf16, #tpu.memory_space<vmem>>, vector<1x8x32xbf16>
      %172 = vector.shape_cast %171 : vector<1x8x32xbf16> to vector<8x32xbf16>
      %cst_112 = arith.constant dense<0.000000e+00> : vector<8x32xf32>
      %173 = tpu.matmul %170, %172, %cst_112 {dimension_numbers = #tpu.dot_dimension_numbers<[1], [0], [0], [1], [0, 0, 1, 1], [], []>} : vector<8x8xbf16>, vector<8x32xbf16>, vector<8x32xf32> -> vector<8x32xf32>
      %174 = arith.addf %163, %173 : vector<8x32xf32>
      %c0_113 = arith.constant 0 : index
      %c0_114 = arith.constant 0 : index
      %175 = vector.load %arg16[%c0_113, %c0_114] : memref<1x32xf32, #tpu.memory_space<vmem>>, vector<1x32xf32>
      %176 = vector.broadcast %175 : vector<1x32xf32> to vector<8x32xf32>
      %177 = arith.addf %174, %176 : vector<8x32xf32>
      %c0_115 = arith.constant 0 : index
      %c0_116 = arith.constant 0 : index
      %c0_117 = arith.constant 0 : index
      %178 = vector.load %arg3[%c0_115, %c0_116, %c0_117] : memref<1x8x32xf32, #tpu.memory_space<vmem>>, vector<1x8x32xf32>
      %179 = vector.shape_cast %178 : vector<1x8x32xf32> to vector<8x32xf32>
      %180 = vector.broadcast %4 : vector<1x32xf32> to vector<8x32xf32>
      %181 = arith.mulf %180, %177 : vector<8x32xf32>
      %182 = arith.addf %179, %181 : vector<8x32xf32>
      %cst_118 = arith.constant dense<0.000000e+00> : vector<8xf32>
      %183 = vector.multi_reduction <add>, %182, %cst_118 [1] : vector<8x32xf32> to vector<8xf32>
      %184 = vector.shape_cast %183 : vector<8xf32> to vector<8x1xf32>
      %cst_119 = arith.constant 3.200000e+01 : f32
      %185 = vector.broadcast %cst_119 : f32 to vector<8x1xf32>
      %186 = arith.divf %184, %185 : vector<8x1xf32>
      %187 = vector.broadcast %186 : vector<8x1xf32> to vector<8x32xf32>
      %188 = arith.subf %182, %187 : vector<8x32xf32>
      %189 = arith.mulf %188, %188 : vector<8x32xf32>
      %cst_120 = arith.constant dense<0.000000e+00> : vector<8xf32>
      %190 = vector.multi_reduction <add>, %189, %cst_120 [1] : vector<8x32xf32> to vector<8xf32>
      %191 = vector.shape_cast %190 : vector<8xf32> to vector<8x1xf32>
      %cst_121 = arith.constant 3.200000e+01 : f32
      %192 = vector.broadcast %cst_121 : f32 to vector<8x1xf32>
      %193 = arith.divf %191, %192 : vector<8x1xf32>
      %194 = vector.broadcast %186 : vector<8x1xf32> to vector<8x32xf32>
      %195 = arith.subf %182, %194 : vector<8x32xf32>
      %cst_122 = arith.constant 9.99999997E-7 : f32
      %196 = vector.broadcast %cst_122 : f32 to vector<8x1xf32>
      %197 = arith.addf %193, %196 : vector<8x1xf32>
      %198 = math.rsqrt %197 : vector<8x1xf32>
      %199 = vector.broadcast %198 : vector<8x1xf32> to vector<8x32xf32>
      %200 = arith.mulf %195, %199 : vector<8x32xf32>
      %cst_123 = arith.constant 1.000000e+00 : f32
      %201 = vector.broadcast %cst_123 : f32 to vector<1x32xf32>
      %202 = arith.addf %201, %6 : vector<1x32xf32>
      %203 = vector.broadcast %202 : vector<1x32xf32> to vector<8x32xf32>
      %204 = arith.mulf %200, %203 : vector<8x32xf32>
      %205 = vector.broadcast %5 : vector<1x32xf32> to vector<8x32xf32>
      %206 = arith.addf %204, %205 : vector<8x32xf32>
      %207 = arith.truncf %206 : vector<8x32xf32> to vector<8x32xbf16>
      %c0_124 = arith.constant 0 : index
      %c0_125 = arith.constant 0 : index
      %208 = vector.load %arg17[%c0_124, %c0_125] : memref<32x64xbf16, #tpu.memory_space<vmem>>, vector<32x64xbf16>
      %cst_126 = arith.constant dense<0.000000e+00> : vector<8x64xf32>
      %209 = tpu.matmul %207, %208, %cst_126 {dimension_numbers = #tpu.dot_dimension_numbers<[1], [0], [0], [1], [0, 0, 1, 1], [], []>} : vector<8x32xbf16>, vector<32x64xbf16>, vector<8x64xf32> -> vector<8x64xf32>
      %c0_127 = arith.constant 0 : index
      %c0_128 = arith.constant 0 : index
      %210 = vector.load %arg18[%c0_127, %c0_128] : memref<1x64xf32, #tpu.memory_space<vmem>>, vector<1x64xf32>
      %211 = vector.broadcast %210 : vector<1x64xf32> to vector<8x64xf32>
      %212 = arith.addf %209, %211 : vector<8x64xf32>
      %cst_129 = arith.constant 5.000000e-01 : f32
      %213 = vector.broadcast %cst_129 : f32 to vector<8x64xf32>
      %214 = arith.mulf %213, %212 : vector<8x64xf32>
      %cst_130 = arith.constant 1.41421354 : f32
      %215 = vector.broadcast %cst_130 : f32 to vector<8x64xf32>
      %216 = arith.divf %212, %215 : vector<8x64xf32>
      %217 = math.erf %216 : vector<8x64xf32>
      %cst_131 = arith.constant 1.000000e+00 : f32
      %218 = vector.broadcast %cst_131 : f32 to vector<8x64xf32>
      %219 = arith.addf %218, %217 : vector<8x64xf32>
      %220 = arith.mulf %214, %219 : vector<8x64xf32>
      %221 = arith.truncf %220 : vector<8x64xf32> to vector<8x64xbf16>
      %c0_132 = arith.constant 0 : index
      %c0_133 = arith.constant 0 : index
      %222 = vector.load %arg19[%c0_132, %c0_133] : memref<64x32xbf16, #tpu.memory_space<vmem>>, vector<64x32xbf16>
      %cst_134 = arith.constant dense<0.000000e+00> : vector<8x32xf32>
      %223 = tpu.matmul %221, %222, %cst_134 {dimension_numbers = #tpu.dot_dimension_numbers<[1], [0], [0], [1], [0, 0, 1, 1], [], []>} : vector<8x64xbf16>, vector<64x32xbf16>, vector<8x32xf32> -> vector<8x32xf32>
      %c0_135 = arith.constant 0 : index
      %c0_136 = arith.constant 0 : index
      %224 = vector.load %arg20[%c0_135, %c0_136] : memref<1x32xf32, #tpu.memory_space<vmem>>, vector<1x32xf32>
      %225 = vector.broadcast %224 : vector<1x32xf32> to vector<8x32xf32>
      %226 = arith.addf %223, %225 : vector<8x32xf32>
      %227 = vector.broadcast %7 : vector<1x32xf32> to vector<8x32xf32>
      %228 = arith.mulf %227, %226 : vector<8x32xf32>
      %229 = arith.addf %182, %228 : vector<8x32xf32>
      %c0_137 = arith.constant 0 : index
      %c0_138 = arith.constant 0 : index
      %c0_139 = arith.constant 0 : index
      %230 = vector.load %arg21[%c0_137, %c0_138, %c0_139] : memref<1x8x32xf32, #tpu.memory_space<vmem>>, vector<1x8x32xf32>
      %231 = vector.shape_cast %230 : vector<1x8x32xf32> to vector<8x32xf32>
      %232 = vector.shape_cast %229 : vector<8x32xf32> to vector<1x8x32xf32>
      tpu.vector_store %arg21[%c0_137, %c0_138, %c0_139], %232 {strides = array<i32>} : memref<1x8x32xf32, #tpu.memory_space<vmem>>, vector<1x8x32xf32>,
    } else {
    }
    return
  }
  func.func @transform_0(%arg0: i32, %arg1: i32, %arg2: i32) -> (i32, i32, i32) {
    %c0_i32 = arith.constant 0 : i32
    %c0_i32_0 = arith.constant 0 : i32
    return %arg0, %arg1, %c0_i32 : i32, i32, i32
  }
  func.func @transform_1(%arg0: i32, %arg1: i32, %arg2: i32) -> (i32, i32, i32) {
    %c0_i32 = arith.constant 0 : i32
    %c0_i32_0 = arith.constant 0 : i32
    return %arg0, %arg2, %c0_i32 : i32, i32, i32
  }
  func.func @transform_2(%arg0: i32, %arg1: i32, %arg2: i32) -> (i32, i32, i32) {
    %c0_i32 = arith.constant 0 : i32
    %c0_i32_0 = arith.constant 0 : i32
    return %arg0, %c0_i32, %arg2 : i32, i32, i32
  }
  func.func @transform_3(%arg0: i32, %arg1: i32, %arg2: i32) -> (i32, i32, i32) {
    %c0_i32 = arith.constant 0 : i32
    %c0_i32_0 = arith.constant 0 : i32
    %c0_i32_1 = arith.constant 0 : i32
    return %arg0, %c0_i32, %c0_i32_0 : i32, i32, i32
  }
  func.func @transform_4(%arg0: i32, %arg1: i32, %arg2: i32) -> (i32, i32) {
    %c0_i32 = arith.constant 0 : i32
    %c0_i32_0 = arith.constant 0 : i32
    %c0_i32_1 = arith.constant 0 : i32
    return %c0_i32, %c0_i32_0 : i32, i32
  }
  func.func @transform_5(%arg0: i32, %arg1: i32, %arg2: i32) -> (i32, i32) {
    %c0_i32 = arith.constant 0 : i32
    %c0_i32_0 = arith.constant 0 : i32
    %c0_i32_1 = arith.constant 0 : i32
    return %c0_i32, %c0_i32_0 : i32, i32
  }
  func.func @transform_6(%arg0: i32, %arg1: i32, %arg2: i32) -> (i32, i32) {
    %c0_i32 = arith.constant 0 : i32
    %c0_i32_0 = arith.constant 0 : i32
    %c0_i32_1 = arith.constant 0 : i32
    return %c0_i32, %c0_i32_0 : i32, i32
  }
  func.func @transform_7(%arg0: i32, %arg1: i32, %arg2: i32) -> (i32, i32) {
    %c0_i32 = arith.constant 0 : i32
    %c0_i32_0 = arith.constant 0 : i32
    %c0_i32_1 = arith.constant 0 : i32
    return %c0_i32, %c0_i32_0 : i32, i32
  }
  func.func @transform_8(%arg0: i32, %arg1: i32, %arg2: i32) -> (i32, i32) {
    %c0_i32 = arith.constant 0 : i32
    %c0_i32_0 = arith.constant 0 : i32
    %c0_i32_1 = arith.constant 0 : i32
    return %c0_i32, %c0_i32_0 : i32, i32
  }
  func.func @transform_9(%arg0: i32, %arg1: i32, %arg2: i32) -> (i32, i32) {
    %c0_i32 = arith.constant 0 : i32
    %c0_i32_0 = arith.constant 0 : i32
    %c0_i32_1 = arith.constant 0 : i32
    return %c0_i32, %c0_i32_0 : i32, i32
  }
  func.func @transform_10(%arg0: i32, %arg1: i32, %arg2: i32) -> (i32, i32, i32) {
    %c0_i32 = arith.constant 0 : i32
    %c0_i32_0 = arith.constant 0 : i32
    %c0_i32_1 = arith.constant 0 : i32
    %c0_i32_2 = arith.constant 0 : i32
    return %c0_i32, %c0_i32_0, %c0_i32_1 : i32, i32, i32
  }
  func.func @transform_11(%arg0: i32, %arg1: i32, %arg2: i32) -> (i32, i32, i32) {
    %c0_i32 = arith.constant 0 : i32
    %c0_i32_0 = arith.constant 0 : i32
    %c0_i32_1 = arith.constant 0 : i32
    %c0_i32_2 = arith.constant 0 : i32
    return %c0_i32, %c0_i32_0, %c0_i32_1 : i32, i32, i32
  }
  func.func @transform_12(%arg0: i32, %arg1: i32, %arg2: i32) -> (i32, i32, i32) {
    %c0_i32 = arith.constant 0 : i32
    %c0_i32_0 = arith.constant 0 : i32
    %c0_i32_1 = arith.constant 0 : i32
    %c0_i32_2 = arith.constant 0 : i32
    return %c0_i32, %c0_i32_0, %c0_i32_1 : i32, i32, i32
  }
  func.func @transform_13(%arg0: i32, %arg1: i32, %arg2: i32) -> (i32, i32) {
    %c0_i32 = arith.constant 0 : i32
    %c0_i32_0 = arith.constant 0 : i32
    %c0_i32_1 = arith.constant 0 : i32
    return %c0_i32, %c0_i32_0 : i32, i32
  }
  func.func @transform_14(%arg0: i32, %arg1: i32, %arg2: i32) -> (i32, i32) {
    %c0_i32 = arith.constant 0 : i32
    %c0_i32_0 = arith.constant 0 : i32
    %c0_i32_1 = arith.constant 0 : i32
    return %c0_i32, %c0_i32_0 : i32, i32
  }
  func.func @transform_15(%arg0: i32, %arg1: i32, %arg2: i32) -> (i32, i32) {
    %c0_i32 = arith.constant 0 : i32
    %c0_i32_0 = arith.constant 0 : i32
    %c0_i32_1 = arith.constant 0 : i32
    return %c0_i32, %c0_i32_0 : i32, i32
  }
  func.func @transform_16(%arg0: i32, %arg1: i32, %arg2: i32) -> (i32, i32) {
    %c0_i32 = arith.constant 0 : i32
    %c0_i32_0 = arith.constant 0 : i32
    %c0_i32_1 = arith.constant 0 : i32
    return %c0_i32, %c0_i32_0 : i32, i32
  }
  func.func @transform_17(%arg0: i32, %arg1: i32, %arg2: i32) -> (i32, i32) {
    %c0_i32 = arith.constant 0 : i32
    %c0_i32_0 = arith.constant 0 : i32
    %c0_i32_1 = arith.constant 0 : i32
    return %c0_i32, %c0_i32_0 : i32, i32
  }
  func.func @transform_18(%arg0: i32, %arg1: i32, %arg2: i32) -> (i32, i32, i32) {
    %c0_i32 = arith.constant 0 : i32
    %c0_i32_0 = arith.constant 0 : i32
    return %arg0, %arg1, %c0_i32 : i32, i32, i32
  }
}

</mosaic_0001>

<bundles_post_ra>
// kernel: tpu_custom_call.1
= control target key start
LH: loop header
LB: loop body
LE: loop exit
PB: predicated region body
PF: predicated region fallthrough
CT: control target
= control target key end

     0   :  { %s3131_s0 = inlined_call_operand.vmem [shape: f32[2,8,32], index: 0, kind: input, shape index: {}]   ;;  %s3132_s1 = inlined_call_operand.vmem [shape: f32[2,8,32], index: 1, kind: input, shape index: {}]   ;;  %s3133_s2 = inlined_call_operand.hbm [shape: f32[2,1,8], index: 2, kind: input, shape index: {}]   ;;  %s3134_s3 = inlined_call_operand.vmem [shape: f32[2,6,32], index: 3, kind: input, shape index: {}]   ;;  %s3135_s4 = inlined_call_operand.vmem [shape: bf16[32,32], index: 4, kind: input, shape index: {}]   ;;  %s3136_s5 = inlined_call_operand.hbm [shape: f32[1,32], index: 5, kind: input, shape index: {}]   ;;  %s3137_s6 = inlined_call_operand.vmem [shape: bf16[32,32], index: 6, kind: input, shape index: {}]   ;;  %s3138_s7 = inlined_call_operand.hbm [shape: f32[1,32], index: 7, kind: input, shape index: {}]   ;;  %s3139_s8 = inlined_call_operand.hbm [shape: bf16[32,32], index: 8, kind: input, shape index: {}]   ;;  %s3140_s9 = inlined_call_operand.hbm [shape: f32[1,32], index: 9, kind: input, shape index: {}]   ;;  %s3141_s10 = inlined_call_operand.vmem [shape: f32[4,1,8], index: 10, kind: input, shape index: {}]   ;;  %s3142_s11 = inlined_call_operand.hbm [shape: f32[4,1,8], index: 11, kind: input, shape index: {}]   ;;  %s3143_s12 = inlined_call_operand.hbm [shape: bf16[4,8,32], index: 12, kind: input, shape index: {}]   ;;  %s3144_s13 = inlined_call_operand.vmem [shape: f32[1,32], index: 13, kind: input, shape index: {}]   ;;  %s3145_s14 = inlined_call_operand.hbm [shape: bf16[32,64], index: 14, kind: input, shape index: {}]   ;;  %s3146_s15 = inlined_call_operand.vmem [shape: f32[1,64], index: 15, kind: input, shape index: {}]   ;;  %s3147_s16 = inlined_call_operand.vmem [shape: bf16[64,32], index: 16, kind: input, shape index: {}]   ;;  %s3148_s17 = inlined_call_operand.vmem [shape: f32[1,32], index: 17, kind: input, shape index: {}]   ;;  %s3149_s18 = inlined_call_operand.hbm [shape: f32[2,8,32], index: 18, kind: output, shape index: {}]  }
   0x1   :  { %3159 = sst [smem:[#allocation29_spill]] %s3131_s0 }
   0x2   :  { %3160 = sst [smem:[#allocation30_spill]] %s3132_s1 }
   0x3   :  { %3161 = sst [smem:[#allocation31_spill]] %s3133_s2 }
   0x4   :  { %3162 = sst [smem:[#allocation32_spill]] %s3136_s5 }
   0x5   :  { %3163 = sst [smem:[#allocation33_spill]] %s3138_s7 }
   0x6   :  { %3164 = sst [smem:[#allocation34_spill]] %s3139_s8 }
   0x7   :  { %3165 = sst [smem:[#allocation35_spill]] %s3141_s10 }
   0x8   :  { %3166 = sst [smem:[#allocation36_spill]] %s3144_s13 }
   0x9   :  { %3167 = sst [smem:[#allocation37_spill]] %s3146_s15 }
   0xa   :  { %3168 = sst [smem:[#allocation38_spill]] %s3147_s16 }
   0xb   :  { %3169 = sst [smem:[#allocation39_spill]] %s3148_s17 }
   0xc   :  { %3170 = sst [smem:[#allocation40_spill]] %s3149_s18 }
   0xd   :  { %23 = vsyncpa [#allocation9], 0 }
   0xe   :  { %25 = vsyncpa [#allocation9 + $0x1], 0 }
   0xf   :  { %26 = vsyncpa [#allocation12], 0 }
  0x10   :  { %27 = vsyncpa [#allocation15], 0 }
  0x11   :  { %28 = vsyncpa [#allocation18], 0 }
  0x12   :  { %29 = vsyncpa [#allocation21], 0 }
  0x13   :  { %30 = vsyncpa [#allocation10], 0 }
  0x14   :  { %32 = vsyncpa [#allocation10 + $0x1], 0  ;;  %s2700_s27 = smov 0   ;;  %s2702_s28 = smov 0  }
  0x15   :  { %s2704_s29 = smov 0   ;;  %s2706_s30 = smov 0  }
  0x16   :  { %s2708_s0 = smov 0   ;;  %s2710_s19 = smov 0  }
  0x17 LB: > { %s3150_s1 = sadd.s32 4294967295, %s2584_s19   ;;  %p1936_p0 = scmp.ge.s32.totalorder %s2584_s19, 1  ;;  %s2584_s19 = sphi %s2710_s19, %s38_s19   ;;  %s2580_s0 = sphi %s2708_s0, %s3197_s0   ;;  %s2576_s30 = sphi %s2706_s30, %s3196_s30   ;;  %s2572_s29 = sphi %s2704_s29, %s3195_s29   ;;  %s2568_s28 = sphi %s2702_s28, %s3194_s28   ;;  %s2564_s27 = sphi %s2700_s27, %s3193_s27  }
  0x18   : > { %p2734_p1 = scmp.eq.s32.totalorder %s3150_s1, 0  ;;  %p494_p2 = scmp.lt.s32.totalorder %s2584_s19, 3 }
  0x19   : > { %s3172_s5 = sld [smem:[#allocation32_spill]]  ;;  %p1944_p4 = scmp.ge.s32.totalorder %s2584_s19, 2 }
  0x1a   : > { %p2742_p3 = pnand %p1936_p0, %p494_p2  ;;  %s2586_s24 = smov [#allocation11]  }
  0x1b   : > { %s511_s25 = sshll.u32 %s2586_s24, 4  ;;  %s3174_s8 = sld [smem:[#allocation34_spill]]  ;;  %s512_s25 = int_to_ptr.vmem [resolvable:$true] %s511_s25 }
  0x1c   : > { %p2080_p5 = pneg %p2742_p3  ;;  %s2587_s22 = smov [#allocation14]  }
  0x1d   : > { %s3154_s24 = smov 64   ;;  %s3156_s17 = smov 4  }
  0x1e   : > { %p2754_p6 = pnand %p2080_p5, %p2734_p1  ;;  %s2590_s16 = smov [#allocation17]  }
  0x1f   : > { %s509_s2 = sshll.u32 %s3172_s5, 4  ;;  %s537_s5 = sshll.u32 %s2587_s22, 4  ;;  %s510_s2 = int_to_ptr.hbm [resolvable:$true] %s509_s2  ;;  %s538_s5 = int_to_ptr.vmem [resolvable:$true] %s537_s5 }
  0x20   : > { %2083 = dma.hbm_to_vmem [thread:$0]  (!%p2754_p6), %s510_s2, 16, %s512_s25, [#allocation12]  }
  0x21   : > { %s535_s18 = sshll.u32 %s3174_s8, 4  ;;  %s564_s8 = sshll.u32 %s3142_s11, 4  ;;  %s536_s18 = int_to_ptr.hbm [resolvable:$true] %s535_s18  ;;  %s565_s8 = int_to_ptr.hbm [resolvable:$true] %s564_s8 }
  0x22   : > { %2089 = dma.hbm_to_vmem [thread:$0]  (!%p2754_p6), %s536_s18, 256, %s538_s5, [#allocation15], %s3154_s24, %s3154_s24, %s3156_s17  }
  0x23   : > { %s566_s15 = sshll.u32 %s2590_s16, 4  ;;  %s3176_s7 = sld [smem:[#allocation33_spill]]  ;;  %s567_s15 = int_to_ptr.vmem [resolvable:$true] %s566_s15 }
  0x24   : > { %s2591_s25 = smov 16   ;;  %s2592_s10 = smov 1  }
  0x25   : > { %2095 = dma.hbm_to_vmem [thread:$0]  (!%p2754_p6), %s565_s8, 64, %s567_s15, [#allocation18], %s2591_s25, %s2591_s25, %s2592_s10  }
  0x26   : > { %s2593_s5 = smov [#allocation13]   ;;  %s550_s26 = sshll.u32 %s3140_s9, 4  ;;  %s551_s26 = int_to_ptr.hbm [resolvable:$true] %s550_s26 }
  0x27   : > { %s526_s18 = sshll.u32 %s2593_s5, 4  ;;  %s578_s22 = sshll.u32 %s3143_s12, 4  ;;  %s527_s18 = int_to_ptr.vmem [resolvable:$true] %s526_s18  ;;  %s579_s22 = int_to_ptr.hbm [resolvable:$true] %s578_s22 }
  0x28   : > { %s2594_s17 = smov [#allocation16]   ;;  %s2595_s10 = smov [#allocation19]  }
  0x29   : > { %s524_s2 = sshll.u32 %s3176_s7, 4  ;;  %s552_s8 = sshll.u32 %s2594_s17, 4  ;;  %s525_s2 = int_to_ptr.hbm [resolvable:$true] %s524_s2  ;;  %s553_s8 = int_to_ptr.vmem [resolvable:$true] %s552_s8 }
  0x2a   : > { %2086 = dma.hbm_to_vmem [thread:$0]  (!%p2754_p6), %s525_s2, 16, %s527_s18, [#allocation12]  }
  0x2b   : > { %2092 = dma.hbm_to_vmem [thread:$0]  (!%p2754_p6), %s551_s26, 16, %s553_s8, [#allocation15]  }
  0x2c   : > { %s580_s15 = sshll.u32 %s2595_s10, 4  ;;  %s595_s25 = sshll.u32 %s3145_s14, 4  ;;  %s581_s15 = int_to_ptr.vmem [resolvable:$true] %s580_s15  ;;  %s596_s25 = int_to_ptr.hbm [resolvable:$true] %s595_s25 }
  0x2d   : > { %s3177_s17 = smov 4   ;;  %s3178_s5 = smov 64  }
  0x2e   : > { %2098 = dma.hbm_to_vmem [thread:$0]  (!%p2754_p6), %s579_s22, 256, %s581_s15, [#allocation18], %s3178_s5, %s3178_s5, %s3177_s17  }
  0x2f   : > { %s2596_s18 = smov [#allocation20]   ;;  %s1935_s26 = sadd.s32 4294967294, %s2584_s19  }
  0x30   : > { %s597_s1 = sshll.u32 %s2596_s18, 4  ;;  %s57_s16 = sadd.s32 1, %s2580_s0  ;;  %s598_s1 = int_to_ptr.vmem [resolvable:$true] %s597_s1 }
  0x31   : > { %2101 = dma.hbm_to_vmem [thread:$0]  (!%p2754_p6), %s596_s25, 256, %s598_s1, [#allocation21], %s3178_s5, %s3178_s5, %s3177_s17  }
  0x32   : > { %s122_s13 = sadd.s32 1, %s2572_s29  ;;  %p59_p7 = scmp.ge.s32.totalorder %s57_s16, 2 }
  0x33   : > { %p129_p8 = scmp.ne.s32.totalorder %s2572_s29, %s2568_s28  ;;  %p130_p9 = scmp.eq.s32.totalorder %s2584_s19, 0 }
  0x34   : > { %p135_p10 = scmp.ne.s32.totalorder %s2568_s28, %s2564_s27  ;;  %s3199_s16 = smov (%p59_p7, %s57_s16), 0 }
  0x35   : > { %p2806_p11 = por %p130_p9, %p129_p8  ;;  %s117_s8 = ssub.s32 %s2580_s0, %s3199_s16 }
  0x36   : > { %p2812_p12 = por %p2734_p1, %p135_p10  ;;  %s3181_s10 = sadd.s32 4294967295, %s2584_s19  }
  0x37   : > { %p481_p13 = scmp.eq.s32.totalorder %s3181_s10, 1  ;;  %p120_p0 = scmp.eq.s32.totalorder %s117_s8, 0 }
  0x38   : > { %p487_p2 = scmp.eq.s32.totalorder %s1935_s26, 1  ;;  %p2117_p6 = scmp.lt.s32.totalorder %s2584_s19, 2 }
  0x39   : > { %p2820_p5 = por %p481_p13, %p129_p8  ;;  %s640_s25 = sand.u32 1, %s2572_s29  }
  0x3a   : > { %s2826_s24 = scalar_select %p120_p0, %s2572_s29, %s122_s13  }
  0x3b   : > { %p2828_p7 = por %p487_p2, %p135_p10  ;;  %s3184_s18 = sld [smem:[#allocation31_spill]] }
  0x3c   : > { %s643_s7 = scalar_lea.vmem [#allocation8], %s640_s25  ;;  %p2103_p8 = pnand %p2117_p6, %p2806_p11 }
  0x3d   : > { %s651_s10 = sshll.u32 %s643_s7, 4  ;;  %s641_s26 = scalar_lea.sflag [#allocation9], %s640_s25  ;;  %s652_s10 = int_to_ptr.vmem [resolvable:$true] %s651_s10 }
  0x3e   : > { %s2842_s13 = sand.u32 (!%p2742_p3), 1, %s2568_s28  }
  0x3f   : > { %667 = sbr.rel (%p2742_p3) target bundleno = 1957 (0x7a5), region = 92  ;;  %s670_s17 = scalar_lea.sflag (!%p2742_p3), [#allocation9], %s2842_s13 }
  0x40   : > { %s672_s5 = scalar_lea.vmem (!%p2742_p3), [#allocation8], %s2842_s13 }
  0x41   : > { %s647_s1 = scalar_lea.hbm %s3184_s18, %s2580_s0 }
  0x42   : > { %s649_s8 = sshll.u32 %s647_s1, 4  ;;  %s650_s8 = int_to_ptr.hbm [resolvable:$true] %s649_s8 }
  0x43   : > { %2105 = dma.hbm_to_vmem [thread:$0]  (!%p2103_p8), %s650_s8, 16, %s652_s10, %s641_s26  }
  0x44   : > { %2539 = dma.done.wait (%p2812_p12), %s670_s17, 16  }
  0x45   : > { %2541 = vsyncadd (%p2812_p12), %s670_s17, 4294967280 }
  0x46   : > { %2543 = dma.done.wait (%p2734_p1), [#allocation12], 32  }
  0x47   : > { %2545 = vsyncadd (%p2734_p1), [#allocation12], 4294967264 }
  0x48   : > { %2547 = dma.done.wait (%p2734_p1), [#allocation15], 272  }
  0x49   : > { %2549 = vsyncadd (%p2734_p1), [#allocation15], 4294967024 }
  0x4a   : > { %2551 = dma.done.wait (%p2734_p1), [#allocation18], 320  }
  0x4b   : > { %2553 = vsyncadd (%p2734_p1), [#allocation18], 4294966976 }
  0x4c   : > { %2555 = dma.done.wait (%p2734_p1), [#allocation21], 256  }
  0x4d   : > { %2557 = vsyncadd (%p2734_p1), [#allocation21], 4294967040  ;;  %p778_p3 = scmp.lt.s32.totalorder %s2576_s30, 1  ;;  %s3185_s25 = sld [smem:[#allocation30_spill]]  ;;  %vm803_vm0 = vcmask 261120   ;;  %v2597_v4 = vmov 32.0  }
  0x4e   : > { %s3186_s8 = sld [smem:[#allocation29_spill]]  ;;  %2210 = vrcp.f32 %v2597_v4  ;;  %v2030_v21 = vld [vmem:[%s3137_s6 + $0x8] sm:$0xff]  ;;  %v2032_v22 = vld [vmem:[#allocation14 + $0x8] sm:$0xff]  ;;  %v2031_v24 = vld [vmem:[#allocation14] sm:$0xff]  ;;  %vm877_vm8 = vcmask 60416   ;;  %s2599_s20 = smov 104  }
  0x4f   : > { %s779_s7 = scalar_select %p778_p3, %s2576_s30, 1  ;;  %1031 = vmatpush.bf16.msra.mxu1 %v2030_v21  ;;  %1064 = vmatpush.bf16.msra.mxu2 %v2032_v22  ;;  %v2029_v23 = vld [vmem:[%s3137_s6] sm:$0xff]  ;;  %v2028_v25 = vld [vmem:[%s3135_s4 + $0x8] sm:$0xff]  ;;  %v2196_v59 = vld [vmem:[#allocation13] ss:$0 sm:$0xff]  ;;  %vm923_vm9 = vcmask 64512  }
  0x50   : > { %868 = vmatpush.bf16.msra.mxu0 %v2028_v25  ;;  %v2027_v27 = vld [vmem:[%s3135_s4] sm:$0xff]  ;;  %vm1331_vm10 = vcmask 1043456   ;;  %s2600_s17 = smov 112   ;;  %s3187_s22 = sld [smem:[#allocation35_spill]]  ;;  %vm936_vm12 = vcmask 7168  }
  0x51   : > { %s2868_s23 = sshll.u32 %s779_s7, 3  ;;  %v2197_v63 = vld [vmem:[#allocation16] ss:$0 sm:$0xff]  ;;  %s3189_s21 = sld [smem:[#allocation37_spill]] }
  0x52   : > { %s3190_s1 = sld [smem:[#allocation38_spill]]  ;;  %s2024_s7 = sshll.u32 %s2576_s30, 3 }
  0x53   : > { %s791_s18 = scalar_lea.vmem %s3185_s25, %s2868_s23  ;;  %1032 = vmatpush.bf16.msra.mxu1 %v2029_v23  ;;  %1065 = vmatpush.bf16.msra.mxu2 %v2031_v24  ;;  %s1730_s30 = scalar_lea.sflag [#allocation10], %s2842_s13 }
  0x54   : > { %v965_v0 = vld [vmem:[%s791_s18] sm:$0xff]  ;;  %s784_s26 = scalar_lea.vmem %s3186_s8, %s2868_s23  ;;  %v2211_v5 = vpop.eup %2210  ;;  %869 = vmatpush.bf16.msra.mxu0 %v2027_v27  ;;  %s3191_s18 = sld [smem:[#allocation39_spill]] }
  0x55   : > { %v967_v1 = vsel %vm803_vm0, %v965_v0, 0.0  ;;  %v2879_v2 = vld [vmem:[%s784_s26] sm:$0xff]  ;;  %v808_v6 = vmul.f32 32.0, %v2211_v5  ;;  %vm812_vm1 = vweird.f32 %v2211_v5  ;;  %s795_s26 = scalar_lea.vmem %s3134_s3, %s2868_s23  ;;  %s2598_s23 = smov 120  }
  0x56   : > { %968 = vadd.xlane.f32.xlu0 %v967_v1  ;;  %v804_v3 = vsel %vm803_vm0, %v2879_v2, 0.0  ;;  %v2908_v35 = vld [vmem:[%s795_s26] sm:$0x3f]  ;;  %s3192_s26 = sld [smem:[#allocation40_spill]] }
  0x57   : > { %v809_v7 = vsub.f32 1.0, %v808_v6  ;;  %v2911_v38 = vadd.f32 1.0, %v2908_v35  ;;  %v836_v46 = vperm.slane %v2908_v35, 0 }
  0x59   : > { %v810_v8 = vmul.f32 %v2211_v5, %v809_v7  ;;  %v834_v43 = vperm.slane %v2911_v38, 1 }
  0x5b   : > { %v811_v9 = vadd.f32 %v2211_v5, %v810_v8 }
  0x5d   : > { %v2883_v10 = vsel %vm812_vm1, %v2211_v5, %v811_v9 }
  0x5e   : > { %805 = vadd.xlane.f32.xlu0 %v804_v3 }
  0xc9   : > { %v969_v11 = vpop.xlane.xlu0 %968 }
  0xca   : > { %v977_v12 = vmul.f32 %v969_v11, %v2883_v10 }
  0xcc   : > { %v978_v13 = vsub.f32 %v965_v0, %v977_v12  ;;  %v2198_v0 = vld [vmem:[#allocation11] ss:$0 sm:$0xff] }
  0xce   : > { %v979_v14 = vmul.f32 %v978_v13, %v978_v13 }
  0xd0   : > { %v980_v15 = vsel %vm803_vm0, %v979_v14, 0.0 }
  0xd1   : > { %981 = vadd.xlane.f32.xlu1 %v980_v15  ;;  %v806_v16 = vpop.xlane.xlu0 %805 }
  0xd2   : > { %v814_v17 = vmul.f32 %v2883_v10, %v806_v16 }
  0xd4   : > { %v815_v18 = vsub.f32 %v2879_v2, %v814_v17 }
  0xd6   : > { %v816_v19 = vmul.f32 %v815_v18, %v815_v18 }
  0xd8   : > { %v817_v20 = vsel %vm803_vm0, %v816_v19, 0.0 }
  0xd9   : > { %818 = vadd.xlane.f32.xlu1 %v817_v20 }
 0x144   : > { %v982_v26 = vpop.xlane.xlu1 %981 }
 0x145   : > { %v983_v28 = vmul.f32 %v982_v26, %v2883_v10 }
 0x147   : > { %v984_v29 = vadd.f32 1e-06, %v983_v28 }
 0x149   : > { %2212 = vrsqrt.f32 %v984_v29  ;;  %vm991_vm3 = vweird.f32 %v984_v29 }
 0x14c   : > { %v819_v30 = vpop.xlane.xlu1 %818 }
 0x14d   : > { %v820_v31 = vmul.f32 %v819_v30, %v2883_v10  ;;  %v2199_v30 = vld [vmem:[%s3187_s22 + $0x3] ss:$0 sm:$0xff] }
 0x14f   : > { %v2213_v32 = vpop.eup %2212  ;;  %v821_v33 = vadd.f32 1e-06, %v820_v31 }
 0x150   : > { %v986_v34 = vmul.f32 %v2213_v32, %v984_v29  ;;  %vm992_vm2 = vweird.f32 %v2213_v32 }
 0x151   : > { %2214 = vrsqrt.f32 %v821_v33  ;;  %vm993_vm4 = vmor %vm991_vm3, %vm992_vm2  ;;  %vm828_vm6 = vweird.f32 %v821_v33 }
 0x152   : > { %v987_v36 = vmul.f32 %v2213_v32, %v986_v34 }
 0x154   : > { %v988_v37 = vmul.f32 0.5, %v987_v36 }
 0x156   : > { %v989_v39 = vsub.f32 1.5, %v988_v37 }
 0x157   : > { %v2215_v40 = vpop.eup %2214 }
 0x158   : > { %v990_v41 = vmul.f32 %v2213_v32, %v989_v39  ;;  %v823_v42 = vmul.f32 %v2215_v40, %v821_v33  ;;  %vm829_vm5 = vweird.f32 %v2215_v40  ;;  %v2200_v39 = vld [vmem:[%s3187_s22 + $0x1] ss:$0 sm:$0xff] }
 0x159   : > { %vm830_vm7 = vmor %vm828_vm6, %vm829_vm5  ;;  %vm1708_vm6 = vcmask 523264  }
 0x15a   : > { %v994_v44 = vsel %vm993_vm4, %v2213_v32, %v990_v41  ;;  %v824_v45 = vmul.f32 %v2215_v40, %v823_v42 }
 0x15b   : > { %v995_v47 = vmul.f32 %v994_v44, %v978_v13 }
 0x15c   : > { %v825_v48 = vmul.f32 0.5, %v824_v45 }
 0x15d   : > { %v998_v49 = vmul.f32 %v995_v47, %v834_v43 }
 0x15e   : > { %v826_v50 = vsub.f32 1.5, %v825_v48 }
 0x15f   : > { %v1000_v51 = vadd.f32 %v998_v49, %v836_v46 }
 0x160   : > { %v827_v52 = vmul.f32 %v2215_v40, %v826_v50  ;;  %v2202_v50 = vld [vmem:[%s3187_s22 + $0x2] ss:$0 sm:$0xff] }
 0x161   : > { %v1001_v53 = vpack.c.bf16 %v1000_v51, %v1000_v51  ;;  %v1108_v51 = vld [vmem:[%s672_s5] sm:$0x1]  ;;  %s1741_s5 = scalar_lea.hbm %s3192_s26, %s2024_s7 }
 0x162   : > { %v831_v54 = vsel %vm830_vm7, %v2215_v40, %v827_v52  ;;  %v2201_v40 = vld [vmem:[%s3187_s22] ss:$0 sm:$0xff]  ;;  %vm1109_vm11 = vcmp.gt.f32.partialorder %v1108_v51, 0.5 }
 0x163   : > { %1974 = vmatmul.msk.bf16.vlgmr.msra.gmra.mxu1 %vm803_vm0, %v1001_v53  ;;  %1983 = vmatmul.msk.bf16.vlgmr.msra.gmra.mxu2 %vm803_vm0, %v1001_v53  ;;  %v832_v55 = vmul.f32 %v831_v54, %v815_v18  ;;  %v2601_v53 = vmov -1e+30  }
 0x164   : > { %v1110_v54 = vsel %vm1109_vm11, 0.0, %v2601_v53 }
 0x165   : > { %v835_v56 = vmul.f32 %v834_v43, %v832_v55 }
 0x167   : > { %v837_v57 = vadd.f32 %v836_v46, %v835_v56  ;;  %v1120_v56 = vperm.slane %v1110_v54, 0 }
 0x169   : > { %v838_v58 = vpack.c.bf16 %v837_v57, %v837_v57 }
 0x16b   : > { %1965 = vmatmul.msk.bf16.vlgmr.msra.gmra.mxu0 %vm803_vm0, %v838_v58 }
 0x1e0   : > { %v1034_v60 = vpop.f32.mrf.mxu1 }
 0x1e1   : > { %v1035_v61 = vadd.f32 %v2196_v59, %v1034_v60 }
 0x1e3   : > { %v1071_v62 = vpack.c.bf16 %v1035_v61, %v1035_v61 }
 0x1e5   : > { %1073 = vst.msk [vmem:[#allocation3] sm:$0xf] %vm877_vm8, %v1071_v62  ;;  %1077 = vrot.lane.b32.xlu0 %v1071_v62, %s2598_s23  ;;  %1098 = vrot.lane.b32.xlu2 %v1071_v62, %s2599_s20 }
 0x1e6   : > { %v1067_v1 = vpop.f32.mrf.mxu2 }
 0x1e7   : > { %v1068_v3 = vadd.f32 %v2197_v63, %v1067_v1  ;;  %v2602_v63 = vmov 0   ;;  %v2603_v1 = vmov 1.0  }
 0x1e8   : > { %v871_v4 = vpop.f32.mrf.mxu0  ;;  %v1036_v5 = vpop.f32.mrf.mxu1  ;;  %2193 = vset.pattern.permute.xlu0 %v2602_v63  ;;  %2194 = vset.pattern.permute.xlu2 %v2602_v63  ;;  %941 = vst.msk [vmem:[#allocation6] sm:$0xff] %vm936_vm12, %v2603_v1 }
 0x1e9   : > { %v2921_v6 = vpack.c.bf16 %v1068_v3, %v1068_v3  ;;  %v872_v7 = vadd.f32 %v2198_v0, %v871_v4  ;;  %2195 = vset.pattern.permute.xlu1 %v2602_v63  ;;  %942 = vst.msk [vmem:[#allocation6 + $0x8] sm:$0xff] %vm936_vm12, %v2603_v1 }
 0x1ea   : > { %943 = vst.msk [vmem:[#allocation6 + $0x10] sm:$0xff] %vm936_vm12, %v2603_v1 }
 0x1eb   : > { %1075 = vst.msk [vmem:[#allocation4] sm:$0xf] %vm877_vm8, %v2921_v6  ;;  %v875_v8 = vmul.f32 0.35355338, %v872_v7 }
 0x1ec   : > { %v1115_v9 = vld [vmem:[#allocation3] sm:$0xf]  ;;  %944 = vst.msk [vmem:[#allocation6 + $0x18] sm:$0xff] %vm936_vm12, %v2603_v1 }
 0x1ed   : > { %v876_v11 = vpack.c.bf16 %v875_v8, %v875_v8  ;;  %v1127_v12 = vsel %vm923_vm9, %v1115_v9, 0 }
 0x1ee   : > { %v1069_v13 = vpop.f32.mrf.mxu2  ;;  %1136 = vmatpush.bf16.xpose.msra.mxu3 %v1127_v12 }
 0x1ef   : > { %878 = vst.msk [vmem:[#allocation2] sm:$0xf] %vm877_vm8, %v876_v11  ;;  %880 = vrot.lane.b32.xlu1 %v876_v11, %s2598_s23  ;;  %890 = vrot.lane.b32.xlu2 %v876_v11, %s2599_s20 }
 0x1f0   : > { %v873_v14 = vpop.f32.mrf.mxu0 }
 0x1f2   : > { %v1324_v15 = vld [vmem:[#allocation4] sm:$0xf] }
 0x1f3   : > { %v1333_v16 = vsel %vm1331_vm10, %v1324_v15, 0 }
 0x1f6   : > { %1342 = vmatpush.bf16.msrb.mxu3 %v1333_v16  ;;  %v1111_v17 = vld [vmem:[#allocation2] sm:$0xf] }
 0x1f7   : > { %1088 = vrot.lane.b32.xlu2 %v1071_v62, %s2600_s17  ;;  %1984 = vmatmul.msk.bf16.vlgmr.msra.gmra.mxu3 %vm923_vm9, %v1111_v17 }
 0x1ff   : > { %885 = vrot.lane.b32.xlu2 %v876_v11, %s2600_s17 }
 0x23f   : > { %v1099_v18 = vpop.permute.xlu2 %1098 }
 0x240   : > { %1102 = vst.msk [vmem:[#allocation3 + $0xc] sm:$0xf] %vm877_vm8, %v1099_v18 }
 0x247   : > { %v1118_v19 = vld [vmem:[#allocation3 + $0xc] sm:$0xf] }
 0x248   : > { %v1184_v20 = vsel %vm923_vm9, %v1118_v19, 0 }
 0x249   : > { %1193 = vmatpush.bf16.xpose.msrb.mxu2 %v1184_v20  ;;  %v891_v21 = vpop.permute.xlu2 %890 }
 0x24a   : > { %894 = vst.msk [vmem:[#allocation2 + $0xc] sm:$0xf] %vm877_vm8, %v891_v21 }
 0x251   : > { %v1089_v22 = vpop.permute.xlu2 %1088  ;;  %v1114_v23 = vld [vmem:[#allocation2 + $0xc] sm:$0xf] }
 0x252   : > { %1092 = vst.msk [vmem:[#allocation3 + $0x8] sm:$0xf] %vm877_vm8, %v1089_v22  ;;  %1987 = vmatmul.msk.bf16.vlgmr.msrb.gmra.mxu2 %vm923_vm9, %v1114_v23 }
 0x257   : > { %v1078_v24 = vpop.permute.xlu0 %1077 }
 0x258   : > { %1081 = vst.msk [vmem:[#allocation3 + $0x4] sm:$0xf] %vm877_vm8, %v1078_v24 }
 0x259   : > { %v886_v25 = vpop.permute.xlu2 %885  ;;  %v1117_v26 = vld [vmem:[#allocation3 + $0x8] sm:$0xf] }
 0x25a   : > { %889 = vst.msk [vmem:[#allocation2 + $0x8] sm:$0xf] %vm877_vm8, %v886_v25  ;;  %v1165_v27 = vsel %vm923_vm9, %v1117_v26, 0 }
 0x25b   : > { %1174 = vmatpush.bf16.xpose.msrb.mxu1 %v1165_v27 }
 0x25f   : > { %v1116_v28 = vld [vmem:[#allocation3 + $0x4] sm:$0xf] }
 0x260   : > { %v1146_v29 = vsel %vm923_vm9, %v1116_v28, 0 }
 0x261   : > { %1155 = vmatpush.bf16.xpose.msrb.mxu0 %v1146_v29  ;;  %v881_v31 = vpop.permute.xlu1 %880  ;;  %v1113_v32 = vld [vmem:[#allocation2 + $0x8] sm:$0xf] }
 0x262   : > { %v2047_v33 = vld [vmem:[#allocation2 + $0x8] sm:$0xff]   ;;  %884 = vst.msk [vmem:[#allocation2 + $0x4] sm:$0xf] %vm877_vm8, %v881_v31  ;;  %1986 = vmatmul.msk.bf16.vlgmr.msrb.gmra.mxu1 %vm923_vm9, %v1113_v32 }
 0x263   : > { %v2046_v34 = vunpack.c.h.bf16 %v2047_v33  ;;  %v2045_v49 = vunpack.c.l.bf16 %v2047_v33 }
 0x265   : > { %v922_v36 = vmul.f32 %v2199_v30, %v2046_v34  ;;  %v921_v52 = vmul.f32 %v2202_v50, %v2045_v49 }
 0x267   : > { %v933_v37 = vsel %vm923_vm9, %v922_v36, 0.0  ;;  %v930_v55 = vsel %vm923_vm9, %v921_v52, 0.0 }
 0x268   : > { %934 = vadd.xlane.f32.xlu2 %v933_v37 }
 0x269   : > { %v1112_v41 = vld [vmem:[#allocation2 + $0x4] sm:$0xf] }
 0x26a   : > { %v2040_v42 = vld [vmem:[#allocation2] sm:$0xff]   ;;  %1985 = vmatmul.msk.bf16.vlgmr.msrb.gmra.mxu0 %vm923_vm9, %v1112_v41 }
 0x26b   : > { %v2042_v43 = vunpack.c.h.bf16 %v2040_v42  ;;  %v2041_v44 = vunpack.c.l.bf16 %v2040_v42 }
 0x26d   : > { %v920_v45 = vmul.f32 %v2200_v39, %v2042_v43  ;;  %v919_v46 = vmul.f32 %v2201_v40, %v2041_v44 }
 0x26f   : > { %v927_v47 = vsel %vm923_vm9, %v920_v45, 0.0  ;;  %v924_v48 = vsel %vm923_vm9, %v919_v46, 0.0 }
 0x270   : > { %928 = vadd.xlane.f32.xlu1 %v927_v47  ;;  %925 = vadd.xlane.f32.xlu0 %v924_v48 }
 0x278   : > { %931 = vadd.xlane.f32.xlu0 %v930_v55 }
 0x27a   : > { %v1138_v57 = vpop.f32.mrf.mxu3 }
 0x27b   : > { %v2963_v58 = vadd.f32 %v1138_v57, %v1120_v56 }
 0x27d   : > { %v1203_v59 = vsel %vm923_vm9, %v2963_v58, -inf }
 0x27e   : > { %1204 = vmax.xlane.f32.xlu2 %v1203_v59 }
 0x282   : > { %v1140_v60 = vpop.f32.mrf.mxu3 }
 0x2d5   : > { %v1195_v61 = vpop.f32.mrf.mxu2 }
 0x2d6   : > { %v2967_v62 = vadd.f32 %v1195_v61, %v1120_v56 }
 0x2d8   : > { %v1212_v0 = vsel %vm923_vm9, %v2967_v62, -inf }
 0x2d9   : > { %1213 = vmax.xlane.f32.xlu2 %v1212_v0 }
 0x2db   : > { %v935_v3 = vpop.xlane.xlu2 %934 }
 0x2dc   : > { %940 = vst.msk [vmem:[#allocation5 + $0x18] sm:$0xff] %vm936_vm12, %v935_v3 }
 0x2dd   : > { %v1197_v4 = vpop.f32.mrf.mxu2 }
 0x2df   : > { %v1176_v5 = vpop.f32.mrf.mxu1 }
 0x2e0   : > { %v2976_v7 = vadd.f32 %v1176_v5, %v1120_v56 }
 0x2e2   : > { %v1209_v11 = vsel %vm923_vm9, %v2976_v7, -inf }
 0x2e3   : > { %v929_v8 = vpop.xlane.xlu1 %928  ;;  %v926_v9 = vpop.xlane.xlu0 %925  ;;  %1210 = vmax.xlane.f32.xlu0 %v1209_v11  ;;  %v1202_v22 = vld [vmem:[#allocation5 + $0x18] sm:$0xff] }
 0x2e4   : > { %938 = vst.msk [vmem:[#allocation5 + $0x8] sm:$0xff] %vm936_vm12, %v929_v8 }
 0x2e5   : > { %937 = vst.msk [vmem:[#allocation5] sm:$0xff] %vm936_vm12, %v926_v9 }
 0x2e7   : > { %v1157_v12 = vpop.f32.mrf.mxu0  ;;  %v1178_v13 = vpop.f32.mrf.mxu1 }
 0x2e8   : > { %v2982_v14 = vadd.f32 %v1157_v12, %v1120_v56 }
 0x2ea   : > { %v1206_v16 = vsel %vm923_vm9, %v2982_v14, -inf }
 0x2eb   : > { %v932_v15 = vpop.xlane.xlu0 %931  ;;  %1207 = vmax.xlane.f32.xlu1 %v1206_v16  ;;  %v1200_v28 = vld [vmem:[#allocation5 + $0x8] sm:$0xff] }
 0x2ec   : > { %939 = vst.msk [vmem:[#allocation5 + $0x10] sm:$0xff] %vm936_vm12, %v932_v15  ;;  %v2987_v19 = vld [vmem:[#allocation5] sm:$0xff]  ;;  %v2204_v15 = vld [vmem:[#allocation17 + $0x2] ss:$0 sm:$0xff] }
 0x2ed   : > { %963 = vst.msk [vmem:[#allocation7 + $0x10] sm:$0xff] %vm923_vm9, %v2204_v15  ;;  %v1447_v15 = vld [vmem:[#allocation19 + $0x4] sm:$0xf] }
 0x2ef   : > { %v1159_v17 = vpop.f32.mrf.mxu0 }
 0x2f0   : > { %v1263_v17 = vld [vmem:[#allocation6] sm:$0xff] }
 0x2f1   : > { %v1205_v18 = vpop.xlane.xlu2 %1204 }
 0x2f2   : > { %v2990_v20 = vmax.f32 %v2987_v19, %v1205_v18 }
 0x2f3   : > { %v1201_v25 = vld [vmem:[#allocation5 + $0x10] sm:$0xff] }
 0x2f4   : > { %v1219_v21 = vsub.f32 %v2987_v19, %v2990_v20  ;;  %1413 = vst.msk [vmem:[#allocation5] sm:$0xff] %vm936_vm12, %v2990_v20  ;;  %v2205_v19 = vld [vmem:[#allocation17 + $0x1] ss:$0 sm:$0xff] }
 0x2f5   : > { %962 = vst.msk [vmem:[#allocation7 + $0x8] sm:$0xff] %vm923_vm9, %v2205_v19 }
 0x2f7   : > { %1233 = vperm.xlu0 %2193, %v2990_v20   ;;  %v2206_v20 = vld [vmem:[#allocation17] ss:$0 sm:$0xff] }
 0x2f8   : > { %961 = vst.msk [vmem:[#allocation7] sm:$0xff] %vm923_vm9, %v2206_v20 }
 0x304   : > { %1103 = vrot.lane.b32.xlu1 %v2921_v6, %s2599_s20  ;;  %s3188_s20 = sld [smem:[#allocation36_spill]] }
 0x30c   : > { %1083 = vrot.lane.b32.xlu1 %v2921_v6, %s2598_s23 }
 0x314   : > { %1093 = vrot.lane.b32.xlu1 %v2921_v6, %s2600_s17  ;;  %s1953_s17 = sshll.u32 %s2842_s13, 3 }
 0x315   : > { %s777_s23 = scalar_lea.vmem [#allocation22], %s1953_s17 }
 0x34c   : > { %v1214_v23 = vpop.xlane.xlu2 %1213 }
 0x34d   : > { %v1218_v24 = vmax.f32 %v1202_v22, %v1214_v23 }
 0x34f   : > { %1416 = vst.msk [vmem:[#allocation5 + $0x18] sm:$0xff] %vm936_vm12, %v1218_v24  ;;  %1248 = vperm.xlu2 %2194, %v1218_v24   ;;  %v1222_v40 = vsub.f32 %v1202_v22, %v1218_v24 }
 0x351   : > { %v1229_v43 = vmul.f32 1.442695, %v1222_v40 }
 0x356   : > { %v1211_v26 = vpop.xlane.xlu0 %1210 }
 0x357   : > { %v1217_v27 = vmax.f32 %v1201_v25, %v1211_v26 }
 0x359   : > { %1415 = vst.msk [vmem:[#allocation5 + $0x10] sm:$0xff] %vm936_vm12, %v1217_v27  ;;  %v1221_v45 = vsub.f32 %v1201_v25, %v1217_v27 }
 0x35b   : > { %v1227_v48 = vmul.f32 1.442695, %v1221_v45 }
 0x35e   : > { %v1208_v29 = vpop.xlane.xlu1 %1207 }
 0x35f   : > { %v1216_v30 = vmax.f32 %v1200_v28, %v1208_v29 }
 0x361   : > { %v1220_v31 = vsub.f32 %v1200_v28, %v1216_v30  ;;  %1414 = vst.msk [vmem:[#allocation5 + $0x8] sm:$0xff] %vm936_vm12, %v1216_v30  ;;  %1238 = vperm.xlu2 %2194, %v1216_v30  }
 0x363   : > { %v1225_v0 = vmul.f32 1.442695, %v1220_v31 }
 0x369   : > { %1243 = vperm.xlu2 %2194, %v1217_v27   ;;  %v1234_v6 = vpop.permute.xlu0 %1233 }
 0x36a   : > { %v1251_v32 = vsub.f32 %v2963_v58, %v1234_v6 }
 0x36c   : > { %v1255_v33 = vmul.f32 1.442695, %v1251_v32 }
 0x36e   : > { %2216 = vpow2.f32 %v1255_v33  ;;  %v1264_v33 = vld [vmem:[#allocation6 + $0x8] sm:$0xff] }
 0x36f   : > { %2218 = vpow2.f32 %v1229_v43  ;;  %v1265_v43 = vld [vmem:[#allocation6 + $0x10] sm:$0xff] }
 0x370   : > { %2220 = vpow2.f32 %v1227_v48 }
 0x374   : > { %v2217_v34 = vpop.eup %2216 }
 0x375   : > { %v1271_v36 = vsel %vm923_vm9, %v2217_v34, 0.0  ;;  %v1320_v37 = vpack.c.bf16 %v2217_v34, %v2217_v34  ;;  %v3014_v50 = vpop.eup %2218 }
 0x376   : > { %v1104_v39 = vpop.permute.xlu1 %1103  ;;  %1272 = vadd.xlane.f32.xlu0 %v1271_v36  ;;  %v3018_v53 = vpop.eup %2220 }
 0x377   : > { %1107 = vst.msk [vmem:[#allocation4 + $0xc] sm:$0xf] %vm877_vm8, %v1104_v39  ;;  %1988 = vmatmul.msk.bf16.vlgmr.msrb.gmra.mxu3 %vm923_vm9, %v1320_v37 }
 0x37e   : > { %v1084_v41 = vpop.permute.xlu1 %1083  ;;  %v1327_v42 = vld [vmem:[#allocation4 + $0xc] sm:$0xf] }
 0x37f   : > { %1087 = vst.msk [vmem:[#allocation4 + $0x4] sm:$0xf] %vm877_vm8, %v1084_v41  ;;  %v1390_v44 = vsel %vm1331_vm10, %v1327_v42, 0 }
 0x380   : > { %1399 = vmatpush.bf16.msra.mxu2 %v1390_v44  ;;  %v1293_v44 = vld [vmem:[#allocation7 + $0x8] sm:$0xff] }
 0x386   : > { %v1094_v46 = vpop.permute.xlu1 %1093  ;;  %v1325_v47 = vld [vmem:[#allocation4 + $0x4] sm:$0xf] }
 0x387   : > { %1097 = vst.msk [vmem:[#allocation4 + $0x8] sm:$0xf] %vm877_vm8, %v1094_v46  ;;  %v1352_v49 = vsel %vm1331_vm10, %v1325_v47, 0  ;;  %v1269_v47 = vmul.f32 %v3018_v53, %v1265_v43 }
 0x388   : > { %1361 = vmatpush.bf16.msra.mxu0 %v1352_v49 }
 0x38a   : > { %1313 = vperm.xlu0 %2193, %v3014_v50  }
 0x38e   : > { %v1326_v51 = vld [vmem:[#allocation4 + $0x8] sm:$0xf] }
 0x38f   : > { %v1371_v52 = vsel %vm1331_vm10, %v1326_v51, 0 }
 0x390   : > { %1380 = vmatpush.bf16.msra.mxu1 %v1371_v52 }
 0x392   : > { %1308 = vperm.xlu0 %2193, %v3018_v53  }
 0x3a9   : > { %v1249_v54 = vpop.permute.xlu2 %1248 }
 0x3aa   : > { %v1254_v55 = vsub.f32 %v2967_v62, %v1249_v54 }
 0x3ac   : > { %v1261_v56 = vmul.f32 1.442695, %v1254_v55  ;;  %v1292_v55 = vld [vmem:[#allocation7] sm:$0xff] }
 0x3ae   : > { %2222 = vpow2.f32 %v1261_v56  ;;  %v1294_v56 = vld [vmem:[#allocation7 + $0x10] sm:$0xff] }
 0x3b4   : > { %v2223_v57 = vpop.eup %2222 }
 0x3b5   : > { %v1323_v58 = vpack.c.bf16 %v2223_v57, %v2223_v57  ;;  %v1280_v59 = vsel %vm923_vm9, %v2223_v57, 0.0 }
 0x3b6   : > { %1281 = vadd.xlane.f32.xlu1 %v1280_v59 }
 0x3b7   : > { %1991 = vmatmul.msk.bf16.vlgmr.msra.gmra.mxu2 %vm923_vm9, %v1323_v58 }
 0x3bb   : > { %v1239_v60 = vpop.permute.xlu2 %1238 }
 0x3bc   : > { %v1252_v61 = vsub.f32 %v2982_v14, %v1239_v60  ;;  %v1223_v14 = vmul.f32 1.442695, %v1219_v21  ;;  %v1266_v21 = vld [vmem:[#allocation6 + $0x18] sm:$0xff] }
 0x3bd   : > { %v1270_v28 = vmul.f32 %v3014_v50, %v1266_v21 }
 0x3be   : > { %v1257_v63 = vmul.f32 1.442695, %v1252_v61 }
 0x3c0   : > { %2224 = vpow2.f32 %v1257_v63 }
 0x3c1   : > { %2226 = vpow2.f32 %v1225_v0 }
 0x3c3   : > { %v1244_v1 = vpop.permute.xlu2 %1243 }
 0x3c4   : > { %v1253_v3 = vsub.f32 %v2976_v7, %v1244_v1  ;;  %v2203_v7 = vld [vmem:[#allocation17 + $0x3] ss:$0 sm:$0xff] }
 0x3c5   : > { %964 = vst.msk [vmem:[#allocation7 + $0x18] sm:$0xff] %vm923_vm9, %v2203_v7  ;;  %v1527_v7 = vld [vmem:[#allocation19 + $0xc] sm:$0xf] }
 0x3c6   : > { %v2225_v4 = vpop.eup %2224  ;;  %v1259_v62 = vmul.f32 1.442695, %v1253_v3  ;;  %v1436_v3 = vld [vmem:[#allocation19] sm:$0xf] }
 0x3c7   : > { %v1321_v5 = vpack.c.bf16 %v2225_v4, %v2225_v4  ;;  %v1274_v8 = vsel %vm923_vm9, %v2225_v4, 0.0  ;;  %v2227_v9 = vpop.eup %2226 }
 0x3c8   : > { %2228 = vpow2.f32 %v1259_v62  ;;  %1275 = vadd.xlane.f32.xlu2 %v1274_v8  ;;  %v1268_v39 = vmul.f32 %v2227_v9, %v1264_v33  ;;  %v1471_v62 = vsel %vm1331_vm10, %v1436_v3, 0 }
 0x3c9   : > { %1989 = vmatmul.msk.bf16.vlgmr.msra.gmra.mxu0 %vm923_vm9, %v1321_v5  ;;  %2230 = vpow2.f32 %v1223_v14  ;;  %v1532_v14 = vsel %vm1331_vm10, %v1527_v7, 0 }
 0x3ca   : > { %1480 = vmatpush.bf16.msrb.mxu0 %v1471_v62  ;;  %1541 = vmatpush.bf16.msrb.mxu2 %v1532_v14 }
 0x3cc   : > { %v1295_v6 = vld [vmem:[#allocation7 + $0x18] sm:$0xff] }
 0x3ce   : > { %v2229_v11 = vpop.eup %2228 }
 0x3cf   : > { %v1322_v12 = vpack.c.bf16 %v2229_v11, %v2229_v11  ;;  %1303 = vperm.xlu1 %2195, %v2227_v9   ;;  %v1277_v13 = vsel %vm923_vm9, %v2229_v11, 0.0  ;;  %v2231_v16 = vpop.eup %2230 }
 0x3d0   : > { %1278 = vadd.xlane.f32.xlu2 %v1277_v13  ;;  %v1267_v18 = vmul.f32 %v2231_v16, %v1263_v17 }
 0x3d1   : > { %1990 = vmatmul.msk.bf16.vlgmr.msra.gmra.mxu1 %vm923_vm9, %v1322_v12 }
 0x3e8   : > { %1298 = vperm.xlu2 %2194, %v2231_v16   ;;  %v1452_v16 = vsel %vm1331_vm10, %v1447_v15, 0 }
 0x3e9   : > { %v1273_v22 = vpop.xlane.xlu0 %1272  ;;  %1461 = vmatpush.bf16.msra.mxu3 %v1452_v16 }
 0x3ea   : > { %v1283_v23 = vadd.f32 %v1273_v22, %v1267_v18 }
 0x3ec   : > { %1288 = vst.msk [vmem:[#allocation6] sm:$0xff] %vm936_vm12, %v1283_v23 }
 0x3f3   : > { %v1420_v24 = vld [vmem:[#allocation6] sm:$0xff] }
 0x3f4   : > { %2232 = vrcp.f32 %v1420_v24  ;;  %v1496_v24 = vld [vmem:[#allocation19 + $0x8] sm:$0xf] }
 0x3fa   : > { %v2233_v25 = vpop.eup %2232  ;;  %v1344_v26 = vpop.f32.mrf.mxu3 }
 0x3fb   : > { %1431 = vperm.xlu0 %2193, %v2233_v25   ;;  %v1501_v25 = vsel %vm1331_vm10, %v1496_v24, 0 }
 0x3fc   : > { %v1314_v32 = vpop.permute.xlu0 %1313  ;;  %1510 = vmatpush.bf16.msrb.mxu1 %v1501_v25  ;;  %v2038_v25 = vld [vmem:[%s3190_s1 + $0x18] sm:$0xff] }
 0x3fd   : > { %v1319_v34 = vmul.f32 %v1314_v32, %v1295_v6  ;;  %1716 = vmatpush.bf16.msra.mxu0 %v2038_v25 }
 0x402   : > { %v1346_v27 = vpop.f32.mrf.mxu3 }
 0x404   : > { %v1309_v57 = vpop.permute.xlu0 %1308 }
 0x405   : > { %v1318_v61 = vmul.f32 %v1309_v57, %v1294_v56  ;;  %v2033_v56 = vld [vmem:[#allocation20] sm:$0xff] }
 0x429   : > { %v1282_v29 = vpop.xlane.xlu1 %1281 }
 0x42a   : > { %v1286_v30 = vadd.f32 %v1282_v29, %v1270_v28 }
 0x42c   : > { %1291 = vst.msk [vmem:[#allocation6 + $0x18] sm:$0xff] %vm936_vm12, %v1286_v30 }
 0x433   : > { %v1423_v31 = vld [vmem:[#allocation6 + $0x18] sm:$0xff] }
 0x434   : > { %2234 = vrcp.f32 %v1423_v31 }
 0x43a   : > { %v2235_v36 = vpop.eup %2234  ;;  %v1401_v37 = vpop.f32.mrf.mxu2 }
 0x43b   : > { %v1408_v40 = vadd.f32 %v1401_v37, %v1319_v34  ;;  %1521 = vperm.xlu2 %2194, %v2235_v36   ;;  %v1276_v41 = vpop.xlane.xlu2 %1275 }
 0x43c   : > { %v1284_v42 = vadd.f32 %v1276_v41, %v1268_v39 }
 0x43d   : > { %1412 = vst.msk [vmem:[#allocation7 + $0x18] sm:$0xff] %vm923_vm9, %v1408_v40  ;;  %v2207_v40 = vld [vmem:[%s3188_s20] ss:$0 sm:$0xff]  ;;  %s1743_s20 = sshll.u32 %s777_s23, 4  ;;  %s1744_s20 = int_to_ptr.vmem [resolvable:$true] %s1743_s20 }
 0x43e   : > { %1289 = vst.msk [vmem:[#allocation6 + $0x8] sm:$0xff] %vm936_vm12, %v1284_v42  ;;  %v1554_v42 = vperm.slane %v2908_v35, 2 }
 0x441   : > { %v1304_v45 = vpop.permute.xlu1 %1303 }
 0x442   : > { %v1403_v46 = vpop.f32.mrf.mxu2  ;;  %v1317_v50 = vmul.f32 %v1304_v45, %v1293_v44 }
 0x443   : > { %v1279_v48 = vpop.xlane.xlu2 %1278 }
 0x444   : > { %v1285_v49 = vadd.f32 %v1279_v48, %v1269_v47  ;;  %v1518_v18 = vld [vmem:[#allocation7 + $0x18] sm:$0xff] }
 0x445   : > { %v1421_v51 = vld [vmem:[#allocation6 + $0x8] sm:$0xff] }
 0x446   : > { %1290 = vst.msk [vmem:[#allocation6 + $0x10] sm:$0xff] %vm936_vm12, %v1285_v49  ;;  %v1363_v52 = vpop.f32.mrf.mxu0  ;;  %2236 = vrcp.f32 %v1421_v51 }
 0x447   : > { %v1406_v54 = vadd.f32 %v1363_v52, %v1317_v50 }
 0x449   : > { %1410 = vst.msk [vmem:[#allocation7 + $0x8] sm:$0xff] %vm923_vm9, %v1406_v54 }
 0x44b   : > { %v1299_v58 = vpop.permute.xlu2 %1298 }
 0x44c   : > { %v2237_v59 = vpop.eup %2236  ;;  %v1316_v60 = vmul.f32 %v1299_v58, %v1292_v55  ;;  %v2034_v55 = vld [vmem:[#allocation20 + $0x8] sm:$0xff] }
 0x44d   : > { %1441 = vperm.xlu1 %2195, %v2237_v59   ;;  %v1422_v53 = vld [vmem:[#allocation6 + $0x10] sm:$0xff]  ;;  %1613 = vmatpush.bf16.msrb.mxu3 %v2034_v55 }
 0x44e   : > { %v1405_v63 = vadd.f32 %v1344_v26, %v1316_v60  ;;  %v1365_v0 = vpop.f32.mrf.mxu0  ;;  %v1382_v1 = vpop.f32.mrf.mxu1  ;;  %2238 = vrcp.f32 %v1422_v53 }
 0x44f   : > { %v1407_v4 = vadd.f32 %v1382_v1, %v1318_v61  ;;  %v1579_v1 = vperm.slane %v2911_v38, 4  ;;  %v2208_v38 = vld [vmem:[%s3189_s21] ss:$0 sm:$0xff] }
 0x450   : > { %1409 = vst.msk [vmem:[#allocation7] sm:$0xff] %vm923_vm9, %v1405_v63  ;;  %v1438_v26 = vld [vmem:[#allocation7 + $0x8] sm:$0xff] }
 0x451   : > { %1411 = vst.msk [vmem:[#allocation7 + $0x10] sm:$0xff] %vm923_vm9, %v1407_v4  ;;  %1614 = vmatpush.bf16.msrb.mxu3 %v2033_v56  ;;  %v1581_v4 = vperm.slane %v2908_v35, 3 }
 0x454   : > { %v2239_v5 = vpop.eup %2238 }
 0x455   : > { %1490 = vperm.xlu1 %2195, %v2239_v5  }
 0x456   : > { %v1384_v8 = vpop.f32.mrf.mxu1 }
 0x457   : > { %v1428_v9 = vld [vmem:[#allocation7] sm:$0xff] }
 0x458   : > { %v1487_v28 = vld [vmem:[#allocation7 + $0x10] sm:$0xff] }
 0x46d   : > { %v1432_v11 = vpop.permute.xlu0 %1431 }
 0x46e   : > { %v1434_v12 = vmul.f32 %v1432_v11, %v1428_v9  ;;  %v2604_v9 = vmov 1.4142135  }
 0x470   : > { %v1435_v13 = vpack.c.bf16 %v1434_v12, %v1434_v12 }
 0x472   : > { %1993 = vmatmul.msk.bf16.vlgmr.msrb.gmra.mxu0 %vm923_vm9, %v1435_v13 }
 0x495   : > { %v1522_v17 = vpop.permute.xlu2 %1521 }
 0x496   : > { %v1524_v22 = vmul.f32 %v1522_v17, %v1518_v18 }
 0x498   : > { %v1525_v23 = vpack.c.bf16 %v1524_v22, %v1524_v22 }
 0x49a   : > { %1995 = vmatmul.msk.bf16.vlgmr.msrb.gmra.mxu2 %vm923_vm9, %v1525_v23 }
 0x4bf   : > { %v1442_v27 = vpop.permute.xlu1 %1441 }
 0x4c0   : > { %v1444_v19 = vmul.f32 %v1442_v27, %v1438_v26 }
 0x4c2   : > { %v1445_v20 = vpack.c.bf16 %v1444_v19, %v1444_v19 }
 0x4c4   : > { %1992 = vmatmul.msk.bf16.vlgmr.msra.gmra.mxu3 %vm923_vm9, %v1445_v20 }
 0x4c7   : > { %v1491_v21 = vpop.permute.xlu1 %1490 }
 0x4c8   : > { %v1493_v29 = vmul.f32 %v1491_v21, %v1487_v28  ;;  %v2037_v21 = vld [vmem:[%s3190_s1 + $0x10] sm:$0xff] }
 0x4c9   : > { %1717 = vmatpush.bf16.msra.mxu0 %v2037_v21 }
 0x4ca   : > { %v1494_v30 = vpack.c.bf16 %v1493_v29, %v1493_v29 }
 0x4cc   : > { %1994 = vmatmul.msk.bf16.vlgmr.msrb.gmra.mxu1 %vm923_vm9, %v1494_v30 }
 0x4ef   : > { %v1482_v31 = vpop.f32.mrf.mxu0 }
 0x4f7   : > { %v1484_v6 = vpop.f32.mrf.mxu0 }
 0x4f8   : > { %v2036_v6 = vld [vmem:[%s3190_s1 + $0x8] sm:$0xff] }
 0x4f9   : > { %1718 = vmatpush.bf16.msra.mxu0 %v2036_v6 }
 0x51d   : > { %v1543_v32 = vpop.f32.mrf.mxu2 }
 0x525   : > { %v1545_v33 = vpop.f32.mrf.mxu2 }
 0x547   : > { %v1463_v34 = vpop.f32.mrf.mxu3 }
 0x548   : > { %v1483_v36 = vadd.f32 %v1482_v31, %v1463_v34 }
 0x549   : > { %v1512_v37 = vpop.f32.mrf.mxu1 }
 0x54a   : > { %v1516_v39 = vadd.f32 %v1512_v37, %v1483_v36  ;;  %v2035_v36 = vld [vmem:[%s3190_s1] sm:$0xff]  ;;  %s1745_s1 = sshll.u32 %s1741_s5, 4  ;;  %s1746_s1 = int_to_ptr.hbm [resolvable:$true] %s1745_s1 }
 0x54b   : > { %1719 = vmatpush.bf16.msra.mxu0 %v2035_v36  ;;  %s2500_s21 = sshra.s32 %s1746_s1, 4  ;;  %s2501_s21 = int_to_ptr.hbm [resolvable:$true] %s2500_s21 }
 0x54c   : > { %v1547_v41 = vadd.f32 %v1543_v32, %v1516_v39  ;;  %s2502_s25 = scalar_lea.hbm %s2501_s21, 8  ;;  %p2507_p11 = scmp.lt.s32.totalorder %s2501_s21, %s3192_s26 }
 0x54d   : > { %p2503_p1 = scmp.ne.s32.totalorder %s2501_s21, %s2502_s25 }
 0x54e   : > { %v1552_v43 = vadd.f32 %v2207_v40, %v1547_v41 }
 0x54f   : > { %v1465_v44 = vpop.f32.mrf.mxu3  ;;  %p2504_p9 = pnand %p2503_p1, %p2820_p5 }
 0x550   : > { %v1555_v45 = vmul.f32 %v1554_v42, %v1552_v43 }
 0x551   : > { %v1514_v46 = vpop.f32.mrf.mxu1  ;;  %p2505_p10 = pneg %p2504_p9 }
 0x552   : > { %v3060_v47 = vadd.f32 %v1555_v45, %v2879_v2 }
 0x554   : > { %v1557_v48 = vsel %vm803_vm0, %v3060_v47, 0.0 }
 0x555   : > { %1558 = vadd.xlane.f32.xlu2 %v1557_v48 }
 0x5c8   : > { %v1559_v49 = vpop.xlane.xlu2 %1558 }
 0x5c9   : > { %v1560_v50 = vmul.f32 %v1559_v49, %v2883_v10 }
 0x5cb   : > { %v1561_v51 = vsub.f32 %v3060_v47, %v1560_v50 }
 0x5cd   : > { %v1562_v52 = vmul.f32 %v1561_v51, %v1561_v51 }
 0x5cf   : > { %v1563_v54 = vsel %vm803_vm0, %v1562_v52, 0.0 }
 0x5d0   : > { %1564 = vadd.xlane.f32.xlu0 %v1563_v54 }
 0x643   : > { %v1565_v57 = vpop.xlane.xlu0 %1564 }
 0x644   : > { %v1566_v2 = vmul.f32 %v1565_v57, %v2883_v10 }
 0x646   : > { %v1567_v58 = vadd.f32 1e-06, %v1566_v2 }
 0x648   : > { %2240 = vrsqrt.f32 %v1567_v58  ;;  %vm1574_vm14 = vweird.f32 %v1567_v58 }
 0x649   : > { %2242 = vrcp.f32 %v2604_v9 }
 0x64e   : > { %v2241_v59 = vpop.eup %2240 }
 0x64f   : > { %v1569_v60 = vmul.f32 %v2241_v59, %v1567_v58  ;;  %vm1575_vm13 = vweird.f32 %v2241_v59  ;;  %v2243_v11 = vpop.eup %2242 }
 0x650   : > { %vm1576_vm15 = vmor %vm1574_vm14, %vm1575_vm13  ;;  %v1622_v12 = vmul.f32 1.4142135, %v2243_v11  ;;  %vm1626_vm1 = vweird.f32 %v2243_v11 }
 0x651   : > { %v1570_v61 = vmul.f32 %v2241_v59, %v1569_v60 }
 0x652   : > { %v1623_v13 = vsub.f32 1.0, %v1622_v12 }
 0x653   : > { %v1571_v53 = vmul.f32 0.5, %v1570_v61 }
 0x654   : > { %v1624_v7 = vmul.f32 %v2243_v11, %v1623_v13 }
 0x655   : > { %v1572_v63 = vsub.f32 1.5, %v1571_v53 }
 0x656   : > { %v1625_v14 = vadd.f32 %v2243_v11, %v1624_v7 }
 0x657   : > { %v1573_v0 = vmul.f32 %v2241_v59, %v1572_v63 }
 0x658   : > { %v1627_v16 = vsel %vm1626_vm1, %v2243_v11, %v1625_v14 }
 0x659   : > { %v1577_v3 = vsel %vm1576_vm15, %v2241_v59, %v1573_v0 }
 0x65a   : > { %v1578_v62 = vmul.f32 %v1577_v3, %v1561_v51  ;;  %v1725_v3 = vperm.slane %v2908_v35, 5 }
 0x65c   : > { %v1580_v5 = vmul.f32 %v1579_v1, %v1578_v62  ;;  %v2209_v1 = vld [vmem:[%s3191_s18] ss:$0 sm:$0xff]  ;;  %s2506_s18 = scalar_lea.hbm %s3192_s26, 16 }
 0x65d   : > { %p2508_p12 = scmp.lt.s32.totalorder %s2506_s18, %s2502_s25 }
 0x65e   : > { %v1582_v8 = vadd.f32 %v1581_v4, %v1580_v5 }
 0x65f   : > { %p2509_p13 = por %p2508_p12, %p2507_p11 }
 0x660   : > { %v1583_v10 = vpack.c.bf16 %v1582_v8, %v1582_v8 }
 0x661   : > { %p2510_p0 = pnand %p2509_p13, %p2505_p10 }
 0x662   : > { %2004 = vmatmul.msk.bf16.vlgmr.msrb.gmra.mxu3 %vm803_vm0, %v1583_v10 }
 0x6e5   : > { %v1616_v15 = vpop.f32.mrf.mxu3 }
 0x6e6   : > { %v1617_v17 = vadd.f32 %v2208_v38, %v1616_v15 }
 0x6e8   : > { %v1628_v18 = vmul.f32 %v1627_v16, %v1617_v17  ;;  %v1620_v61 = vmul.f32 0.5, %v1617_v17 }
 0x6ea   : > { %v1629_v22 = vmul.f32 %v1628_v18, %v1628_v18 }
 0x6ec   : > { %v1630_v23 = vmin.f32 %v1629_v22, 16.0 }
 0x6ed   : > { %v1618_v24 = vpop.f32.mrf.mxu3 }
 0x6ee   : > { %v1631_v26 = vmul.f32 2.1237322e-06, %v1630_v23  ;;  %v1642_v27 = vmul.f32 3.8918573e-05, %v1630_v23 }
 0x6f0   : > { %v1632_v19 = vadd.f32 0.00028619796, %v1631_v26  ;;  %v1643_v20 = vadd.f32 0.001143296, %v1642_v27 }
 0x6f2   : > { %v1633_v28 = vmul.f32 %v1632_v19, %v1630_v23  ;;  %v1644_v29 = vmul.f32 %v1643_v20, %v1630_v23 }
 0x6f4   : > { %v1645_v30 = vadd.f32 0.014752088, %v1644_v29  ;;  %v1634_v31 = vadd.f32 0.0036580483, %v1633_v28 }
 0x6f6   : > { %v1646_v32 = vmul.f32 %v1645_v30, %v1630_v23  ;;  %v1635_v34 = vmul.f32 %v1634_v31, %v1630_v23 }
 0x6f8   : > { %v1647_v33 = vadd.f32 0.112945676, %v1646_v32  ;;  %v1636_v40 = vadd.f32 0.05243302, %v1635_v34 }
 0x6fa   : > { %v1648_v37 = vmul.f32 %v1647_v33, %v1630_v23  ;;  %v1637_v43 = vmul.f32 %v1636_v40, %v1630_v23 }
 0x6fc   : > { %v1649_v39 = vadd.f32 0.4994258, %v1648_v37  ;;  %v1638_v44 = vadd.f32 0.18741608, %v1637_v43 }
 0x6fe   : > { %v1650_v41 = vmul.f32 %v1649_v39, %v1630_v23  ;;  %v1639_v46 = vmul.f32 %v1638_v44, %v1630_v23 }
 0x700   : > { %v1651_v42 = vadd.f32 1.0, %v1650_v41  ;;  %v1640_v51 = vadd.f32 1.1283791, %v1639_v46 }
 0x702   : > { %2244 = vrcp.f32 %v1651_v42  ;;  %v1663_v50 = vand.u32 2147483648, %v1651_v42  ;;  %v1661_v54 = vand.u32 2147483647, %v1651_v42  ;;  %vm1657_vm3 = vweird.f32 %v1651_v42 }
 0x703   : > { %v1641_v57 = vmul.f32 %v1640_v51, %v1628_v18 }
 0x704   : > { %v1664_v56 = vor.u32 1.1754944e-38, %v1663_v50  ;;  %vm1662_vm5 = vcmp.eq.f32.partialorder %v1661_v54, 8.507059e+37 }
 0x708   : > { %v2245_v45 = vpop.eup %2244 }
 0x709   : > { %v1653_v48 = vmul.f32 %v2245_v45, %v1651_v42  ;;  %vm1658_vm2 = vweird.f32 %v2245_v45 }
 0x70a   : > { %vm1659_vm4 = vmor %vm1657_vm3, %vm1658_vm2 }
 0x70b   : > { %v1654_v49 = vsub.f32 1.0, %v1653_v48 }
 0x70d   : > { %v1655_v52 = vmul.f32 %v2245_v45, %v1654_v49 }
 0x70f   : > { %v1656_v55 = vadd.f32 %v2245_v45, %v1655_v52 }
 0x711   : > { %v1660_v2 = vsel %vm1659_vm4, %v2245_v45, %v1656_v55 }
 0x712   : > { %v1665_v58 = vsel %vm1662_vm5, %v1664_v56, %v1660_v2 }
 0x713   : > { %v1666_v59 = vmul.f32 %v1665_v58, %v1641_v57 }
 0x715   : > { %v2005_v60 = vclamps-f32 %v1666_v59, 1.0 }
 0x717   : > { %v1669_v53 = vadd.f32 1.0, %v2005_v60 }
 0x719   : > { %v1670_v63 = vmul.f32 %v1669_v53, %v1620_v61 }
 0x71b   : > { %v1671_v0 = vpack.c.bf16 %v1670_v63, %v1670_v63 }
 0x71d   : > { %2022 = vmatmul.msk.bf16.vlgmr.msra.gmra.mxu0 %vm1708_vm6, %v1671_v0 }
 0x79a   : > { %v1721_v4 = vpop.f32.mrf.mxu0 }
 0x79b   : > { %v1722_v62 = vadd.f32 %v2209_v1, %v1721_v4 }
 0x79d   : > { %v1726_v5 = vmul.f32 %v1725_v3, %v1722_v62 }
 0x79f   : > { %v1727_v8 = vadd.f32 %v1726_v5, %v3060_v47 }
 0x7a1   : > { %1728 = vst.msk [vmem:[%s777_s23] sm:$0xff] %vm803_vm0, %v1727_v8 }
 0x7a2   : > { %v1723_v10 = vpop.f32.mrf.mxu0 }
 0x7a3   : > { %2513 = shalt.err (!%p2510_p0)
}
 0x7a4   : > { %2078 = dma.vmem_to_hbm [thread:$0]  (%p2820_p5), %s1744_s20, 128, %s1746_s1, %s1730_s30  }
 0x7a5 PF: > { %s1757_s13 = sand.u32 1, %s2564_s27   ;;  %p2107_p2 = pnand %p1944_p4, %p2828_p7 }
 0x7a6   : > { %s1758_s5 = scalar_lea.sflag [#allocation10], %s1757_s13 }
 0x7a7   : > { %p2108_p6 = pneg %p2107_p2 }
 0x7a9   : > { %2559 = dma.done.wait (%p2108_p6), %s1758_s5, 128  }
 0x7aa   : > { %2561 = vsyncadd (%p2108_p6), %s1758_s5, 4294967168  ;;  %s38_s19 = sadd.s32 1, %s2584_s19   ;;  %s3193_s27 = smov %s2568_s28 }
 0x7ab   : > { %p35_p8 = scmp.ge.s32.totalorder %s38_s19, 4   ;;  %s3194_s28 = smov %s2572_s29 }
 0x7ac   : > { %s3195_s29 = smov %s2826_s24  ;;  %s3196_s30 = smov %s2580_s0 }
 0x7ad   : > { %s3197_s0 = smov %s3199_s16  ;;  %37 = sbr.rel (!%p35_p8) target bundleno = 23 (0x17), region = 197 }
 0x7b2   :  { %1764 = vsyncpa [#allocation9], 1 }
 0x7b3   :  { %1766 = vsyncpa [#allocation9 + $0x1], 1 }
 0x7b4   :  { %1767 = vsyncpa [#allocation12], 1 }
 0x7b5   :  { %1768 = vsyncpa [#allocation15], 1 }
 0x7b6   :  { %1769 = vsyncpa [#allocation18], 1 }
 0x7b7   :  { %1770 = vsyncpa [#allocation21], 1 }
 0x7b8   :  { %1771 = vsyncpa [#allocation10], 1 }
 0x7b9   :  { %1773 = vsyncpa [#allocation10 + $0x1], 1 }

</bundles_post_ra>
